<compile_context>
chip_gen: v7x
topology: tpu7x:2x2x1
jax: 0.10.0
libtpu: 0.0.40
codegen_flags: <defaults>
</compile_context>

<pallas_src>
import jax
import jax.numpy as jnp
from jax import lax
from jax.experimental import pallas as pl
from jax.experimental.pallas import tpu as pltpu


_CHUNK = 256  # batch columns per inner step: full MXU width on v6e/v7x and keeps the
              # per-chunk activation chain comfortably inside the 64-vreg file.


# ---------------------------------------------------------------------------
# Kernel: fused MLP over one [tile, 5] batch block, chunked along the batch.
#   x_ref  : [tile, 5]   f32 (native PyTorch layout, batch-major)
#   wN     : [out, in]   (bf16 by default; PyTorch nn.Linear layout)
#   bN     : [out, 1]    f32
#   w5t    : [32, 1]     f32 (fc5 weight, pre-transposed for the reduction)
#   o_ref  : [1, tile]   f32 (lane-dense sigmoid outputs)
# ---------------------------------------------------------------------------
def _make_mlp_kernel(n_chunks: int, chunk: int):
    def kernel(x_ref,
               w1_ref, b1_ref, w2_ref, b2_ref, w3_ref, b3_ref, w4_ref, b4_ref,
               w5t_ref, b5_ref, o_ref):

        def dense_relu(w_ref, b_ref, h):
            # [out, in] @ [in, C] on the MXU with f32 accumulation; bias + ReLU
            # stay in f32 on the VPU.  Activations are cast to the (pre-cast)
            # weight dtype so the MXU sees bf16 inputs by default.
            y = jnp.dot(w_ref[...], h.astype(w_ref.dtype),
                        preferred_element_type=jnp.float32)
            return jnp.maximum(y + b_ref[...], 0.0)

        # Static full unroll: n_chunks is a small compile-time constant (<= 16),
        # so every slice below is static (zero runtime cost) and the scheduler
        # sees the whole chain.
        for c in range(n_chunks):
            start = c * chunk
            xc = x_ref[pl.ds(start, chunk), :]                      # [C, 5] f32

            # fc1: contract the 5-feature axis of both operands; the MXU folds
            # the rhs transpose, so x never needs a wrapper-side transpose and
            # the result is lane-dense [16, C] (batch on the lane axis).
            h = lax.dot_general(
                w1_ref[...], xc.astype(w1_ref.dtype),
                dimension_numbers=(((1,), (1,)), ((), ())),
                preferred_element_type=jnp.float32)
            h = jnp.maximum(h + b1_ref[...], 0.0)                   # [16, C]

            h = dense_relu(w2_ref, b2_ref, h)                       # [32, C]
            h = dense_relu(w3_ref, b3_ref, h)                       # [64, C]
            h = dense_relu(w4_ref, b4_ref, h)                       # [32, C]

            # fc5 (out_features == 1) off the MXU: weighted sublane reduction
            # (VPU multiply + XLU reduce), all in f32.
            z = jnp.sum(h * w5t_ref[...], axis=0, keepdims=True) + b5_ref[...]

            # Exact, overflow-safe sigmoid: exp of a non-positive argument only.
            e = jnp.exp(-jnp.abs(z))
            inv = 1.0 / (1.0 + e)
            o_ref[:, pl.ds(start, chunk)] = jnp.where(z >= 0.0, inv, e * inv)

    return kernel


# ---------------------------------------------------------------------------
# Tiling: big batch tiles (cap raised to 4096), but >= 2 (even) grid steps
# whenever there is enough work so both v7x TensorCores get balanced tiles.
# ---------------------------------------------------------------------------
def _choose_tiling(batch: int, *, chunk: int = _CHUNK, max_tile: int = 4096,
                   requested_tile=None):
    if requested_tile is not None:
        assert requested_tile % chunk == 0, "batch_tile must be a multiple of the chunk"
        tile = requested_tile
    elif batch < 2 * chunk:
        tile = chunk
    else:
        steps = pl.cdiv(batch, max_tile)
        steps = max(2, steps + (steps % 2))          # even, >= 2
        tile = pl.cdiv(pl.cdiv(batch, steps), chunk) * chunk
    return tile, pl.cdiv(batch, tile)


# ---------------------------------------------------------------------------
# Wrapper
# ---------------------------------------------------------------------------
def fire_risk_model(x, params, *, batch_tile=None, chunk=_CHUNK, use_bf16_matmul=True):
    """FireRiskModel forward.  x: [B, 5] float32; params[name] = (W [out, in], b [out, 1])."""
    B, F = x.shape
    assert F == 5, "FireRiskModel expects 5 input features"

    tile, n_tiles = _choose_tiling(B, chunk=chunk, requested_tile=batch_tile)
    B_pad = n_tiles * tile
    mm_dtype = jnp.bfloat16 if use_bf16_matmul else jnp.float32

    (w1, b1), (w2, b2), (w3, b3), (w4, b4), (w5, b5) = (
        params["fc1"], params["fc2"], params["fc3"], params["fc4"], params["fc5"])

    # bf16 MXU inputs by default, cast once here.  Biases and the fc5 weight
    # stay f32 (they feed VPU work only).
    w5t = w5.T.astype(jnp.float32)                                   # [32, 1]

    # x stays in its native [B, 5] layout (no transpose / feature pad); only the
    # batch is zero-padded, and only when B is not already tile-aligned.
    x_in = x.astype(jnp.float32)
    if B_pad != B:
        x_in = jnp.pad(x_in, ((0, B_pad - B), (0, 0)))

    operands = [x_in,
                w1.astype(mm_dtype), b1.astype(jnp.float32),
                w2.astype(mm_dtype), b2.astype(jnp.float32),
                w3.astype(mm_dtype), b3.astype(jnp.float32),
                w4.astype(mm_dtype), b4.astype(jnp.float32),
                w5t, b5.astype(jnp.float32)]

    # Constant index maps => each weight/bias block is DMA'd to VMEM once
    # (~20 KB total) and never re-streamed across grid steps.
    const_specs = [pl.BlockSpec(a.shape, lambda i: (0, 0)) for a in operands[1:]]
    in_specs = [pl.BlockSpec((tile, F), lambda i: (i, 0))] + const_specs

    out = pl.pallas_call(
        _make_mlp_kernel(tile // chunk, chunk),
        out_shape=jax.ShapeDtypeStruct((1, B_pad), jnp.float32),
        grid_spec=pltpu.PrefetchScalarGridSpec(
            num_scalar_prefetch=0,
            grid=(n_tiles,),
            in_specs=in_specs,
            out_specs=pl.BlockSpec((1, tile), lambda i: (0, i)),
        ),
        compiler_params=pltpu.CompilerParams(
            dimension_semantics=("parallel",),
        ),
    )(*operands)

    # Drop batch padding; return the PyTorch-shaped [B, 1] output (degenerate
    # reshape only — no transpose).
    return out[0, :B][:, None]


# ---------------------------------------------------------------------------
# Deterministic parameter init in PyTorch layout: W [out, in], b [out, 1].
# ---------------------------------------------------------------------------
def init_params(key):
    dims = [5, 16, 32, 64, 32, 1]
    names = ["fc1", "fc2", "fc3", "fc4", "fc5"]
    params = {}
    for name, d_in, d_out in zip(names, dims[:-1], dims[1:]):
        key, kw, kb = jax.random.split(key, 3)
        bound = 1.0 / jnp.sqrt(d_in)   # PyTorch default uniform(-1/sqrt(fan_in), ...)
        w = jax.random.uniform(kw, (d_out, d_in), jnp.float32, -bound, bound)
        b = jax.random.uniform(kb, (d_out, 1), jnp.float32, -bound, bound)
        params[name] = (w, b)
    return params


# Pure-JAX reference (mirrors the PyTorch forward; highest-precision matmuls).
def _ref_forward(x, params):
    h = x
    for name in ["fc1", "fc2", "fc3", "fc4"]:
        w, b = params[name]
        h = jnp.maximum(
            jnp.dot(h, w.T, precision=jax.lax.Precision.HIGHEST) + b[:, 0], 0.0)
    w, b = params["fc5"]
    return jax.nn.sigmoid(
        jnp.dot(h, w.T, precision=jax.lax.Precision.HIGHEST) + b[:, 0])


if __name__ == "__main__":
    key = jax.random.PRNGKey(0)
    key, kx = jax.random.split(key)

    # Not tile-aligned: exercises batch padding, 2 "parallel" grid steps, and a
    # 2-chunk inner loop per step.
    B = 600
    x = jax.random.normal(kx, (B, 5), jnp.float32)
    params = init_params(key)

    out = fire_risk_model(x, params)          # bf16 MXU inputs, f32 accumulation
    out = jax.block_until_ready(out)

    ref = _ref_forward(x, params)
    assert out.shape == (B, 1)
    assert bool(jnp.all(jnp.isfinite(out)))
    # bf16 matmul inputs (f32 accumulation) through 5 tiny layers: error on a
    # [0,1] probability output stays well inside 5e-3.
    assert jnp.allclose(out, ref, atol=5e-3, rtol=0.0), "mismatch vs reference"

    print("KERNEL_OK")
</pallas_src>

<mosaic_0001>
module attributes {stable_mosaic.version = 11 : i64} {
  func.func @kernel(%arg0: i32, %arg1: memref<512x5xf32, #tpu.memory_space<vmem>>, %arg2: memref<16x5xbf16, #tpu.memory_space<vmem>>, %arg3: memref<16x1xf32, #tpu.memory_space<vmem>>, %arg4: memref<32x16xbf16, #tpu.memory_space<vmem>>, %arg5: memref<32x1xf32, #tpu.memory_space<vmem>>, %arg6: memref<64x32xbf16, #tpu.memory_space<vmem>>, %arg7: memref<64x1xf32, #tpu.memory_space<vmem>>, %arg8: memref<32x64xbf16, #tpu.memory_space<vmem>>, %arg9: memref<32x1xf32, #tpu.memory_space<vmem>>, %arg10: memref<32x1xf32, #tpu.memory_space<vmem>>, %arg11: memref<1x1xf32, #tpu.memory_space<vmem>>, %arg12: memref<1x512xf32, #tpu.memory_space<vmem>>) attributes {dimension_semantics = [#tpu.dimension_semantics<parallel>], iteration_bounds = array<i64: 2>, scalar_prefetch = 0 : i64, scratch_operands = 0 : i64, tpu.core_type = #tpu.core_type<tc>, window_params = [{transform_indices = @transform_0, window_bounds = array<i64: 512, 5>}, {pipeline_mode = #tpu.pipeline_mode<synchronous>, transform_indices = @transform_1, window_bounds = array<i64: 16, 5>}, {pipeline_mode = #tpu.pipeline_mode<synchronous>, transform_indices = @transform_2, window_bounds = array<i64: 16, 1>}, {pipeline_mode = #tpu.pipeline_mode<synchronous>, transform_indices = @transform_3, window_bounds = array<i64: 32, 16>}, {pipeline_mode = #tpu.pipeline_mode<synchronous>, transform_indices = @transform_4, window_bounds = array<i64: 32, 1>}, {pipeline_mode = #tpu.pipeline_mode<synchronous>, transform_indices = @transform_5, window_bounds = array<i64: 64, 32>}, {pipeline_mode = #tpu.pipeline_mode<synchronous>, transform_indices = @transform_6, window_bounds = array<i64: 64, 1>}, {pipeline_mode = #tpu.pipeline_mode<synchronous>, transform_indices = @transform_7, window_bounds = array<i64: 32, 64>}, {pipeline_mode = #tpu.pipeline_mode<synchronous>, transform_indices = @transform_8, window_bounds = array<i64: 32, 1>}, {pipeline_mode = #tpu.pipeline_mode<synchronous>, transform_indices = @transform_9, window_bounds = array<i64: 32, 1>}, {pipeline_mode = #tpu.pipeline_mode<synchronous>, transform_indices = @transform_10, window_bounds = array<i64: 1, 1>}, {transform_indices = @transform_11, window_bounds = array<i64: 1, 512>}]} {
    %c0 = arith.constant 0 : index
    %c0_0 = arith.constant 0 : index
    %0 = vector.load %arg1[%c0, %c0_0] : memref<512x5xf32, #tpu.memory_space<vmem>>, vector<256x5xf32>
    %c0_1 = arith.constant 0 : index
    %c0_2 = arith.constant 0 : index
    %1 = vector.load %arg2[%c0_1, %c0_2] : memref<16x5xbf16, #tpu.memory_space<vmem>>, vector<16x5xbf16>
    %2 = arith.truncf %0 : vector<256x5xf32> to vector<256x5xbf16>
    %cst = arith.constant dense<0.000000e+00> : vector<16x256xf32>
    %3 = tpu.matmul %1, %2, %cst {dimension_numbers = #tpu.dot_dimension_numbers<[1], [1], [0], [0], [0, 0, 1, 0], [], []>} : vector<16x5xbf16>, vector<256x5xbf16>, vector<16x256xf32> -> vector<16x256xf32>
    %c0_3 = arith.constant 0 : index
    %c0_4 = arith.constant 0 : index
    %4 = vector.load %arg3[%c0_3, %c0_4] : memref<16x1xf32, #tpu.memory_space<vmem>>, vector<16x1xf32>
    %5 = vector.broadcast %4 : vector<16x1xf32> to vector<16x256xf32>
    %6 = arith.addf %3, %5 : vector<16x256xf32>
    %cst_5 = arith.constant 0.000000e+00 : f32
    %7 = vector.broadcast %cst_5 : f32 to vector<16x256xf32>
    %8 = arith.maximumf %6, %7 : vector<16x256xf32>
    %c0_6 = arith.constant 0 : index
    %c0_7 = arith.constant 0 : index
    %9 = vector.load %arg4[%c0_6, %c0_7] : memref<32x16xbf16, #tpu.memory_space<vmem>>, vector<32x16xbf16>
    %10 = arith.truncf %8 : vector<16x256xf32> to vector<16x256xbf16>
    %cst_8 = arith.constant dense<0.000000e+00> : vector<32x256xf32>
    %11 = tpu.matmul %9, %10, %cst_8 {dimension_numbers = #tpu.dot_dimension_numbers<[1], [0], [0], [1], [0, 0, 1, 1], [], []>} : vector<32x16xbf16>, vector<16x256xbf16>, vector<32x256xf32> -> vector<32x256xf32>
    %c0_9 = arith.constant 0 : index
    %c0_10 = arith.constant 0 : index
    %12 = vector.load %arg5[%c0_9, %c0_10] : memref<32x1xf32, #tpu.memory_space<vmem>>, vector<32x1xf32>
    %13 = vector.broadcast %12 : vector<32x1xf32> to vector<32x256xf32>
    %14 = arith.addf %11, %13 : vector<32x256xf32>
    %cst_11 = arith.constant 0.000000e+00 : f32
    %15 = vector.broadcast %cst_11 : f32 to vector<32x256xf32>
    %16 = arith.maximumf %14, %15 : vector<32x256xf32>
    %c0_12 = arith.constant 0 : index
    %c0_13 = arith.constant 0 : index
    %17 = vector.load %arg6[%c0_12, %c0_13] : memref<64x32xbf16, #tpu.memory_space<vmem>>, vector<64x32xbf16>
    %18 = arith.truncf %16 : vector<32x256xf32> to vector<32x256xbf16>
    %cst_14 = arith.constant dense<0.000000e+00> : vector<64x256xf32>
    %19 = tpu.matmul %17, %18, %cst_14 {dimension_numbers = #tpu.dot_dimension_numbers<[1], [0], [0], [1], [0, 0, 1, 1], [], []>} : vector<64x32xbf16>, vector<32x256xbf16>, vector<64x256xf32> -> vector<64x256xf32>
    %c0_15 = arith.constant 0 : index
    %c0_16 = arith.constant 0 : index
    %20 = vector.load %arg7[%c0_15, %c0_16] : memref<64x1xf32, #tpu.memory_space<vmem>>, vector<64x1xf32>
    %21 = vector.broadcast %20 : vector<64x1xf32> to vector<64x256xf32>
    %22 = arith.addf %19, %21 : vector<64x256xf32>
    %cst_17 = arith.constant 0.000000e+00 : f32
    %23 = vector.broadcast %cst_17 : f32 to vector<64x256xf32>
    %24 = arith.maximumf %22, %23 : vector<64x256xf32>
    %c0_18 = arith.constant 0 : index
    %c0_19 = arith.constant 0 : index
    %25 = vector.load %arg8[%c0_18, %c0_19] : memref<32x64xbf16, #tpu.memory_space<vmem>>, vector<32x64xbf16>
    %26 = arith.truncf %24 : vector<64x256xf32> to vector<64x256xbf16>
    %cst_20 = arith.constant dense<0.000000e+00> : vector<32x256xf32>
    %27 = tpu.matmul %25, %26, %cst_20 {dimension_numbers = #tpu.dot_dimension_numbers<[1], [0], [0], [1], [0, 0, 1, 1], [], []>} : vector<32x64xbf16>, vector<64x256xbf16>, vector<32x256xf32> -> vector<32x256xf32>
    %c0_21 = arith.constant 0 : index
    %c0_22 = arith.constant 0 : index
    %28 = vector.load %arg9[%c0_21, %c0_22] : memref<32x1xf32, #tpu.memory_space<vmem>>, vector<32x1xf32>
    %29 = vector.broadcast %28 : vector<32x1xf32> to vector<32x256xf32>
    %30 = arith.addf %27, %29 : vector<32x256xf32>
    %cst_23 = arith.constant 0.000000e+00 : f32
    %31 = vector.broadcast %cst_23 : f32 to vector<32x256xf32>
    %32 = arith.maximumf %30, %31 : vector<32x256xf32>
    %c0_24 = arith.constant 0 : index
    %c0_25 = arith.constant 0 : index
    %33 = vector.load %arg10[%c0_24, %c0_25] : memref<32x1xf32, #tpu.memory_space<vmem>>, vector<32x1xf32>
    %34 = vector.broadcast %33 : vector<32x1xf32> to vector<32x256xf32>
    %35 = arith.mulf %32, %34 : vector<32x256xf32>
    %cst_26 = arith.constant dense<0.000000e+00> : vector<256xf32>
    %36 = vector.multi_reduction <add>, %35, %cst_26 [0] : vector<32x256xf32> to vector<256xf32>
    %37 = vector.shape_cast %36 : vector<256xf32> to vector<1x256xf32>
    %c0_27 = arith.constant 0 : index
    %c0_28 = arith.constant 0 : index
    %38 = vector.load %arg11[%c0_27, %c0_28] : memref<1x1xf32, #tpu.memory_space<vmem>>, vector<1x1xf32>
    %39 = vector.broadcast %38 : vector<1x1xf32> to vector<1x256xf32>
    %40 = arith.addf %37, %39 : vector<1x256xf32>
    %41 = math.absf %40 : vector<1x256xf32>
    %cst_29 = arith.constant 0.000000e+00 : f32
    %42 = vector.broadcast %cst_29 : f32 to vector<1x256xf32>
    %43 = arith.subf %42, %41 : vector<1x256xf32>
    %44 = math.exp %43 : vector<1x256xf32>
    %cst_30 = arith.constant 1.000000e+00 : f32
    %45 = vector.broadcast %cst_30 : f32 to vector<1x256xf32>
    %46 = arith.addf %45, %44 : vector<1x256xf32>
    %cst_31 = arith.constant 1.000000e+00 : f32
    %47 = vector.broadcast %cst_31 : f32 to vector<1x256xf32>
    %48 = arith.divf %47, %46 : vector<1x256xf32>
    %cst_32 = arith.constant 0.000000e+00 : f32
    %49 = vector.broadcast %cst_32 : f32 to vector<1x256xf32>
    %50 = arith.cmpf oge, %40, %49 : vector<1x256xf32>
    %51 = arith.mulf %44, %48 : vector<1x256xf32>
    %52 = arith.select %50, %48, %51 : vector<1x256xi1>, vector<1x256xf32>
    %c0_33 = arith.constant 0 : index
    %c0_34 = arith.constant 0 : index
    %53 = vector.load %arg12[%c0_33, %c0_34] : memref<1x512xf32, #tpu.memory_space<vmem>>, vector<1x256xf32>
    tpu.vector_store %arg12[%c0_33, %c0_34], %52 {strides = array<i32>} : memref<1x512xf32, #tpu.memory_space<vmem>>, vector<1x256xf32>,
    %c256 = arith.constant 256 : index
    %c0_35 = arith.constant 0 : index
    %54 = vector.load %arg1[%c256, %c0_35] : memref<512x5xf32, #tpu.memory_space<vmem>>, vector<256x5xf32>
    %c0_36 = arith.constant 0 : index
    %c0_37 = arith.constant 0 : index
    %55 = vector.load %arg2[%c0_36, %c0_37] : memref<16x5xbf16, #tpu.memory_space<vmem>>, vector<16x5xbf16>
    %56 = arith.truncf %54 : vector<256x5xf32> to vector<256x5xbf16>
    %cst_38 = arith.constant dense<0.000000e+00> : vector<16x256xf32>
    %57 = tpu.matmul %55, %56, %cst_38 {dimension_numbers = #tpu.dot_dimension_numbers<[1], [1], [0], [0], [0, 0, 1, 0], [], []>} : vector<16x5xbf16>, vector<256x5xbf16>, vector<16x256xf32> -> vector<16x256xf32>
    %c0_39 = arith.constant 0 : index
    %c0_40 = arith.constant 0 : index
    %58 = vector.load %arg3[%c0_39, %c0_40] : memref<16x1xf32, #tpu.memory_space<vmem>>, vector<16x1xf32>
    %59 = vector.broadcast %58 : vector<16x1xf32> to vector<16x256xf32>
    %60 = arith.addf %57, %59 : vector<16x256xf32>
    %cst_41 = arith.constant 0.000000e+00 : f32
    %61 = vector.broadcast %cst_41 : f32 to vector<16x256xf32>
    %62 = arith.maximumf %60, %61 : vector<16x256xf32>
    %c0_42 = arith.constant 0 : index
    %c0_43 = arith.constant 0 : index
    %63 = vector.load %arg4[%c0_42, %c0_43] : memref<32x16xbf16, #tpu.memory_space<vmem>>, vector<32x16xbf16>
    %64 = arith.truncf %62 : vector<16x256xf32> to vector<16x256xbf16>
    %cst_44 = arith.constant dense<0.000000e+00> : vector<32x256xf32>
    %65 = tpu.matmul %63, %64, %cst_44 {dimension_numbers = #tpu.dot_dimension_numbers<[1], [0], [0], [1], [0, 0, 1, 1], [], []>} : vector<32x16xbf16>, vector<16x256xbf16>, vector<32x256xf32> -> vector<32x256xf32>
    %c0_45 = arith.constant 0 : index
    %c0_46 = arith.constant 0 : index
    %66 = vector.load %arg5[%c0_45, %c0_46] : memref<32x1xf32, #tpu.memory_space<vmem>>, vector<32x1xf32>
    %67 = vector.broadcast %66 : vector<32x1xf32> to vector<32x256xf32>
    %68 = arith.addf %65, %67 : vector<32x256xf32>
    %cst_47 = arith.constant 0.000000e+00 : f32
    %69 = vector.broadcast %cst_47 : f32 to vector<32x256xf32>
    %70 = arith.maximumf %68, %69 : vector<32x256xf32>
    %c0_48 = arith.constant 0 : index
    %c0_49 = arith.constant 0 : index
    %71 = vector.load %arg6[%c0_48, %c0_49] : memref<64x32xbf16, #tpu.memory_space<vmem>>, vector<64x32xbf16>
    %72 = arith.truncf %70 : vector<32x256xf32> to vector<32x256xbf16>
    %cst_50 = arith.constant dense<0.000000e+00> : vector<64x256xf32>
    %73 = tpu.matmul %71, %72, %cst_50 {dimension_numbers = #tpu.dot_dimension_numbers<[1], [0], [0], [1], [0, 0, 1, 1], [], []>} : vector<64x32xbf16>, vector<32x256xbf16>, vector<64x256xf32> -> vector<64x256xf32>
    %c0_51 = arith.constant 0 : index
    %c0_52 = arith.constant 0 : index
    %74 = vector.load %arg7[%c0_51, %c0_52] : memref<64x1xf32, #tpu.memory_space<vmem>>, vector<64x1xf32>
    %75 = vector.broadcast %74 : vector<64x1xf32> to vector<64x256xf32>
    %76 = arith.addf %73, %75 : vector<64x256xf32>
    %cst_53 = arith.constant 0.000000e+00 : f32
    %77 = vector.broadcast %cst_53 : f32 to vector<64x256xf32>
    %78 = arith.maximumf %76, %77 : vector<64x256xf32>
    %c0_54 = arith.constant 0 : index
    %c0_55 = arith.constant 0 : index
    %79 = vector.load %arg8[%c0_54, %c0_55] : memref<32x64xbf16, #tpu.memory_space<vmem>>, vector<32x64xbf16>
    %80 = arith.truncf %78 : vector<64x256xf32> to vector<64x256xbf16>
    %cst_56 = arith.constant dense<0.000000e+00> : vector<32x256xf32>
    %81 = tpu.matmul %79, %80, %cst_56 {dimension_numbers = #tpu.dot_dimension_numbers<[1], [0], [0], [1], [0, 0, 1, 1], [], []>} : vector<32x64xbf16>, vector<64x256xbf16>, vector<32x256xf32> -> vector<32x256xf32>
    %c0_57 = arith.constant 0 : index
    %c0_58 = arith.constant 0 : index
    %82 = vector.load %arg9[%c0_57, %c0_58] : memref<32x1xf32, #tpu.memory_space<vmem>>, vector<32x1xf32>
    %83 = vector.broadcast %82 : vector<32x1xf32> to vector<32x256xf32>
    %84 = arith.addf %81, %83 : vector<32x256xf32>
    %cst_59 = arith.constant 0.000000e+00 : f32
    %85 = vector.broadcast %cst_59 : f32 to vector<32x256xf32>
    %86 = arith.maximumf %84, %85 : vector<32x256xf32>
    %c0_60 = arith.constant 0 : index
    %c0_61 = arith.constant 0 : index
    %87 = vector.load %arg10[%c0_60, %c0_61] : memref<32x1xf32, #tpu.memory_space<vmem>>, vector<32x1xf32>
    %88 = vector.broadcast %87 : vector<32x1xf32> to vector<32x256xf32>
    %89 = arith.mulf %86, %88 : vector<32x256xf32>
    %cst_62 = arith.constant dense<0.000000e+00> : vector<256xf32>
    %90 = vector.multi_reduction <add>, %89, %cst_62 [0] : vector<32x256xf32> to vector<256xf32>
    %91 = vector.shape_cast %90 : vector<256xf32> to vector<1x256xf32>
    %c0_63 = arith.constant 0 : index
    %c0_64 = arith.constant 0 : index
    %92 = vector.load %arg11[%c0_63, %c0_64] : memref<1x1xf32, #tpu.memory_space<vmem>>, vector<1x1xf32>
    %93 = vector.broadcast %92 : vector<1x1xf32> to vector<1x256xf32>
    %94 = arith.addf %91, %93 : vector<1x256xf32>
    %95 = math.absf %94 : vector<1x256xf32>
    %cst_65 = arith.constant 0.000000e+00 : f32
    %96 = vector.broadcast %cst_65 : f32 to vector<1x256xf32>
    %97 = arith.subf %96, %95 : vector<1x256xf32>
    %98 = math.exp %97 : vector<1x256xf32>
    %cst_66 = arith.constant 1.000000e+00 : f32
    %99 = vector.broadcast %cst_66 : f32 to vector<1x256xf32>
    %100 = arith.addf %99, %98 : vector<1x256xf32>
    %cst_67 = arith.constant 1.000000e+00 : f32
    %101 = vector.broadcast %cst_67 : f32 to vector<1x256xf32>
    %102 = arith.divf %101, %100 : vector<1x256xf32>
    %cst_68 = arith.constant 0.000000e+00 : f32
    %103 = vector.broadcast %cst_68 : f32 to vector<1x256xf32>
    %104 = arith.cmpf oge, %94, %103 : vector<1x256xf32>
    %105 = arith.mulf %98, %102 : vector<1x256xf32>
    %106 = arith.select %104, %102, %105 : vector<1x256xi1>, vector<1x256xf32>
    %c0_69 = arith.constant 0 : index
    %c256_70 = arith.constant 256 : index
    %107 = vector.load %arg12[%c0_69, %c256_70] : memref<1x512xf32, #tpu.memory_space<vmem>>, vector<1x256xf32>
    tpu.vector_store %arg12[%c0_69, %c256_70], %106 {strides = array<i32>} : memref<1x512xf32, #tpu.memory_space<vmem>>, vector<1x256xf32>,
    return
  }
  func.func @transform_0(%arg0: i32) -> (i32, i32) {
    %c0_i32 = arith.constant 0 : i32
    %c0_i32_0 = arith.constant 0 : i32
    return %arg0, %c0_i32 : i32, i32
  }
  func.func @transform_1(%arg0: i32) -> (i32, i32) {
    %c0_i32 = arith.constant 0 : i32
    %c0_i32_0 = arith.constant 0 : i32
    %c0_i32_1 = arith.constant 0 : i32
    return %c0_i32, %c0_i32_0 : i32, i32
  }
  func.func @transform_2(%arg0: i32) -> (i32, i32) {
    %c0_i32 = arith.constant 0 : i32
    %c0_i32_0 = arith.constant 0 : i32
    %c0_i32_1 = arith.constant 0 : i32
    return %c0_i32, %c0_i32_0 : i32, i32
  }
  func.func @transform_3(%arg0: i32) -> (i32, i32) {
    %c0_i32 = arith.constant 0 : i32
    %c0_i32_0 = arith.constant 0 : i32
    %c0_i32_1 = arith.constant 0 : i32
    return %c0_i32, %c0_i32_0 : i32, i32
  }
  func.func @transform_4(%arg0: i32) -> (i32, i32) {
    %c0_i32 = arith.constant 0 : i32
    %c0_i32_0 = arith.constant 0 : i32
    %c0_i32_1 = arith.constant 0 : i32
    return %c0_i32, %c0_i32_0 : i32, i32
  }
  func.func @transform_5(%arg0: i32) -> (i32, i32) {
    %c0_i32 = arith.constant 0 : i32
    %c0_i32_0 = arith.constant 0 : i32
    %c0_i32_1 = arith.constant 0 : i32
    return %c0_i32, %c0_i32_0 : i32, i32
  }
  func.func @transform_6(%arg0: i32) -> (i32, i32) {
    %c0_i32 = arith.constant 0 : i32
    %c0_i32_0 = arith.constant 0 : i32
    %c0_i32_1 = arith.constant 0 : i32
    return %c0_i32, %c0_i32_0 : i32, i32
  }
  func.func @transform_7(%arg0: i32) -> (i32, i32) {
    %c0_i32 = arith.constant 0 : i32
    %c0_i32_0 = arith.constant 0 : i32
    %c0_i32_1 = arith.constant 0 : i32
    return %c0_i32, %c0_i32_0 : i32, i32
  }
  func.func @transform_8(%arg0: i32) -> (i32, i32) {
    %c0_i32 = arith.constant 0 : i32
    %c0_i32_0 = arith.constant 0 : i32
    %c0_i32_1 = arith.constant 0 : i32
    return %c0_i32, %c0_i32_0 : i32, i32
  }
  func.func @transform_9(%arg0: i32) -> (i32, i32) {
    %c0_i32 = arith.constant 0 : i32
    %c0_i32_0 = arith.constant 0 : i32
    %c0_i32_1 = arith.constant 0 : i32
    return %c0_i32, %c0_i32_0 : i32, i32
  }
  func.func @transform_10(%arg0: i32) -> (i32, i32) {
    %c0_i32 = arith.constant 0 : i32
    %c0_i32_0 = arith.constant 0 : i32
    %c0_i32_1 = arith.constant 0 : i32
    return %c0_i32, %c0_i32_0 : i32, i32
  }
  func.func @transform_11(%arg0: i32) -> (i32, i32) {
    %c0_i32 = arith.constant 0 : i32
    %c0_i32_0 = arith.constant 0 : i32
    return %c0_i32, %arg0 : i32, i32
  }
}

</mosaic_0001>

<bundles_post_ra>
// kernel: tpu_custom_call.1
= control target key start
LH: loop header
LB: loop body
LE: loop exit
PB: predicated region body
PF: predicated region fallthrough
CT: control target
= control target key end

     0   :  { %s2583_s0 = inlined_call_operand.vmem [shape: f32[1024,5], index: 0, kind: input, shape index: {}]   ;;  %s2584_s1 = inlined_call_operand.vmem [shape: bf16[16,5], index: 1, kind: input, shape index: {}]   ;;  %s2585_s2 = inlined_call_operand.vmem [shape: f32[16,1], index: 2, kind: input, shape index: {}]   ;;  %s2586_s3 = inlined_call_operand.vmem [shape: bf16[32,16], index: 3, kind: input, shape index: {}]   ;;  %s2587_s4 = inlined_call_operand.vmem [shape: f32[32,1], index: 4, kind: input, shape index: {}]   ;;  %s2588_s5 = inlined_call_operand.vmem [shape: bf16[64,32], index: 5, kind: input, shape index: {}]   ;;  %s2589_s6 = inlined_call_operand.vmem [shape: f32[64,1], index: 6, kind: input, shape index: {}]   ;;  %s2590_s7 = inlined_call_operand.vmem [shape: bf16[32,64], index: 7, kind: input, shape index: {}]   ;;  %s2591_s8 = inlined_call_operand.vmem [shape: f32[32,1], index: 8, kind: input, shape index: {}]   ;;  %s2592_s9 = inlined_call_operand.vmem [shape: f32[32,1], index: 9, kind: input, shape index: {}]   ;;  %s2593_s10 = inlined_call_operand.<no memory space> [shape: f32[1,1], index: 10, kind: input, shape index: {}]   ;;  %s2594_s11 = inlined_call_operand.hbm [shape: f32[1,1024], index: 11, kind: output, shape index: {}]  }
   0x1   :  { %v16_v0 = vstv %s2593_s10 }
   0x2   :  { %17 = vst [vmem:[#allocation2] sm:$0x1] %v16_v0 }
   0x3   :  { %18 = vsyncpa [#allocation4], 0 }
   0x4   :  { %20 = vsyncpa [#allocation4 + $0x1], 0  ;;  %s2117_s19 = smov 0   ;;  %s2119_s20 = smov 0  }
   0x5   :  { %s2121_s21 = smov 0   ;;  %s2123_s22 = smov 0  }
   0x6 LB: > { %s1806_s10 = sadd.s32 4294967295, %s2049_s22   ;;  %s1807_s23 = sadd.s32 4294967294, %s2049_s22   ;;  %s2049_s22 = sphi %s2123_s22, %s2602_s22   ;;  %s2045_s21 = sphi %s2121_s21, %s2601_s21   ;;  %s2041_s20 = sphi %s2119_s20, %s2600_s20   ;;  %s2037_s19 = sphi %s2117_s19, %s2599_s19  }
   0x7   : > { %s2140_s24 = sadd.s32 1, %s2049_s22   ;;  %s269_s25 = sadd.s32 1, %s2045_s21 }
   0x8   : > { %s266_s26 = ssub.s32 %s2049_s22, %s2140_s24  ;;  %p279_p0 = scmp.ne.s32.totalorder %s2045_s21, %s2041_s20 }
   0x9   : > { %p267_p1 = scmp.eq.s32.totalorder %s266_s26, 0  ;;  %p280_p2 = scmp.eq.s32.totalorder %s1806_s10, 1 }
   0xa   : > { %p285_p3 = scmp.ne.s32.totalorder %s2041_s20, %s2037_s19  ;;  %p286_p4 = scmp.eq.s32.totalorder %s1807_s23, 1 }
   0xb   : > { %s2150_s27 = scalar_select %p267_p1, %s2045_s21, %s269_s25  }
   0xc   : > { %p2152_p5 = por %p280_p2, %p279_p0  ;;  %p2156_p6 = por %p286_p4, %p285_p3 }
   0xd   : > { %p1810_p7 = scmp.ge.s32.totalorder %s2049_s22, 1  ;;  %p343_p8 = scmp.lt.s32.totalorder %s2049_s22, 3 }
   0xf   : > { %p344_p9 = pnand %p1810_p7, %p343_p8 }
  0x10   : > { %s2162_s30 = sshll.u32 (!%p344_p9), %s1806_s10, 6  ;;  %v441_v1 = vld [vmem:[%s2585_s2] sm:$0xff] (!%p344_p9)  ;;  %vm458_vm0 = vcmask (!%p344_p9), 39936   ;;  %v2051_v3 = vmov (!%p344_p9), 0   ;;  %v2181_v4 = vld [vmem:[%s2585_s2 + $0x8] sm:$0xff] (!%p344_p9)  ;;  %v565_v6 = vld [vmem:[%s2587_s4 + $0x10] sm:$0xff] (!%p344_p9) }
  0x11   : > { %347 = sbr.rel (%p344_p9) target bundleno = 1873 (0x751), region = 64  ;;  %v2170_v2 = vld [vmem:[%s2584_s1] sm:$0xff] (!%p344_p9)   ;;  %p384_p10 = scmp.lt.s32.totalorder (!%p344_p9), %s2162_s30, 127  ;;  %1951 = vset.pattern.permute.xlu0 (!%p344_p9), %v2051_v3  ;;  %1952 = vset.pattern.permute.xlu1 (!%p344_p9), %v2051_v3  ;;  %v679_v25 = vld [vmem:[%s2589_s6 + $0x10] sm:$0xff] (!%p344_p9)  ;;  %vm597_vm1 = vcmask (!%p344_p9), 130048   ;;  %vm745_vm2 = vcmask (!%p344_p9), 261120  }
  0x12   : > { %445 = vperm.xlu0 (!%p344_p9), %1951, %v441_v1   ;;  %1872 = vmatprep.mubr.msk.bf16.mxu0 (!%p344_p9), %vm458_vm0, %v2170_v2  ;;  %v1237_v5 = vld [vmem:[%s2587_s4] sm:$0xff] (!%p344_p9)  ;;  %v683_v33 = vld [vmem:[%s2589_s6 + $0x30] sm:$0xff] (!%p344_p9)  ;;  %vm893_vm3 = vcmask (!%p344_p9), 523264   ;;  %s2536_s12 = scalar_lea.hbm (!%p344_p9), %s2594_s11, %s2162_s30 }
  0x13   : > { %636 = vmatprep.mubr.bf16.mxu1 (!%p344_p9), %v2051_v3  ;;  %569 = vperm.xlu1 (!%p344_p9), %1952, %v1237_v5   ;;  %v677_v19 = vld [vmem:[%s2589_s6] sm:$0xff] (!%p344_p9) }
  0x14   : > { %v681_v29 = vld [vmem:[%s2589_s6 + $0x20] sm:$0xff] (!%p344_p9) }
  0x15   : > { %v859_v61 = vld [vmem:[%s2591_s8] sm:$0xff] (!%p344_p9) }
  0x16   : > { %450 = vperm.xlu0 (!%p344_p9), %1951, %v2181_v4  }
  0x18   : > { %s385_s16 = scalar_select %p384_p10, %s2162_s30, 127 }
  0x1a   : > { %s1813_s25 = sshll.u32 %s385_s16, 3  ;;  %579 = vperm.xlu0 %1951, %v565_v6   ;;  %s2053_s16 = smov [#allocation3]  }
  0x1b   : > { %s2190_s13 = scalar_lea.vmem %s2583_s0, %s1813_s25  ;;  %s1991_s17 = sshll.u32 %s2053_s16, 4  ;;  %s1992_s17 = int_to_ptr.vmem [resolvable:$false] %s1991_s17 }
  0x1c   : > { %v407_v7 = vld [vmem:[%s2190_s13 + $0x80] sm:$0xff]  ;;  %v408_v8 = vld [vmem:[%s2190_s13 + $0x88] sm:$0xff]  ;;  %v409_v12 = vld [vmem:[%s2190_s13 + $0x90] sm:$0xff]  ;;  %s1993_s30 = scalar_lea.vmem %s1992_s17, 128 }
  0x1d   : > { %v391_v9 = vld [vmem:[%s2190_s13] sm:$0xff]  ;;  %v433_v10 = vpack.c.bf16 %v408_v8, %v407_v7  ;;  %v392_v11 = vld [vmem:[%s2190_s13 + $0x8] sm:$0xff]  ;;  %v410_v13 = vld [vmem:[%s2190_s13 + $0x98] sm:$0xff] }
  0x1e   : > { %v425_v14 = vpack.c.bf16 %v392_v11, %v391_v9  ;;  %v434_v15 = vpack.c.bf16 %v410_v13, %v409_v12  ;;  %v393_v16 = vld [vmem:[%s2190_s13 + $0x10] sm:$0xff]  ;;  %v394_v17 = vld [vmem:[%s2190_s13 + $0x18] sm:$0xff]  ;;  %v395_v21 = vld [vmem:[%s2190_s13 + $0x20] sm:$0xff]  ;;  %687 = vperm.xlu0 %1951, %v677_v19  }
  0x1f   : > { %1894 = vmatprep.subr.msk.bf16.mxu0 %vm458_vm0, %v433_v10  ;;  %v426_v20 = vpack.c.bf16 %v394_v17, %v393_v16  ;;  %v396_v22 = vld [vmem:[%s2190_s13 + $0x28] sm:$0xff]  ;;  %v411_v23 = vld [vmem:[%s2190_s13 + $0xa0] sm:$0xff]  ;;  %v413_v31 = vld [vmem:[%s2190_s13 + $0xb0] sm:$0xff] }
  0x20   : > { %v463_v18 = vsel %vm458_vm0, %v425_v14, 0  ;;  %v412_v24 = vld [vmem:[%s2190_s13 + $0xa8] sm:$0xff]  ;;  %v427_v26 = vpack.c.bf16 %v396_v22, %v395_v21  ;;  %v414_v32 = vld [vmem:[%s2190_s13 + $0xb8] sm:$0xff]  ;;  %v397_v34 = vld [vmem:[%s2190_s13 + $0x30] sm:$0xff] }
  0x21   : > { %1857 = vmatpush3.bf16.xpose.msra.mxu0 %v463_v18  ;;  %v466_v27 = vsel %vm458_vm0, %v426_v20, 0  ;;  %v435_v28 = vpack.c.bf16 %v412_v24, %v411_v23  ;;  %v398_v35 = vld [vmem:[%s2190_s13 + $0x38] sm:$0xff]  ;;  %v436_v36 = vpack.c.bf16 %v414_v32, %v413_v31  ;;  %v415_v38 = vld [vmem:[%s2190_s13 + $0xc0] sm:$0xff]  ;;  %v416_v39 = vld [vmem:[%s2190_s13 + $0xc8] sm:$0xff] }
  0x22   : > { %1895 = vmatprep.subr.msk.bf16.mxu0 %vm458_vm0, %v434_v15  ;;  %697 = vperm.xlu0 %1951, %v679_v25   ;;  %v469_v30 = vsel %vm458_vm0, %v427_v26, 0  ;;  %v428_v37 = vpack.c.bf16 %v398_v35, %v397_v34  ;;  %v437_v41 = vpack.c.bf16 %v416_v39, %v415_v38  ;;  %v399_v42 = vld [vmem:[%s2190_s13 + $0x40] sm:$0xff]  ;;  %v400_v43 = vld [vmem:[%s2190_s13 + $0x48] sm:$0xff]  ;;  %v417_v45 = vld [vmem:[%s2190_s13 + $0xd0] sm:$0xff] }
  0x23   : > { %v429_v44 = vpack.c.bf16 %v400_v43, %v399_v42  ;;  %v418_v46 = vld [vmem:[%s2190_s13 + $0xd8] sm:$0xff]  ;;  %v401_v49 = vld [vmem:[%s2190_s13 + $0x50] sm:$0xff]  ;;  %v419_v52 = vld [vmem:[%s2190_s13 + $0xe0] sm:$0xff] }
  0x24   : > { %v472_v40 = vsel %vm458_vm0, %v428_v37, 0  ;;  %v438_v48 = vpack.c.bf16 %v418_v46, %v417_v45  ;;  %v402_v50 = vld [vmem:[%s2190_s13 + $0x58] sm:$0xff]  ;;  %v420_v53 = vld [vmem:[%s2190_s13 + $0xe8] sm:$0xff]  ;;  %v403_v56 = vld [vmem:[%s2190_s13 + $0x60] sm:$0xff] }
  0x25   : > { %v475_v47 = vsel %vm458_vm0, %v429_v44, 0  ;;  %v430_v51 = vpack.c.bf16 %v402_v50, %v401_v49  ;;  %v439_v55 = vpack.c.bf16 %v420_v53, %v419_v52  ;;  %v404_v57 = vld [vmem:[%s2190_s13 + $0x68] sm:$0xff]  ;;  %v421_v59 = vld [vmem:[%s2190_s13 + $0xf0] sm:$0xff]  ;;  %v422_v60 = vld [vmem:[%s2190_s13 + $0xf8] sm:$0xff] }
  0x26   : > { %707 = vperm.xlu0 %1951, %v681_v29   ;;  %v431_v58 = vpack.c.bf16 %v404_v57, %v403_v56  ;;  %v440_v63 = vpack.c.bf16 %v422_v60, %v421_v59  ;;  %v405_v0 = vld [vmem:[%s2190_s13 + $0x70] sm:$0xff]  ;;  %v862_v8 = vld [vmem:[%s2591_s8 + $0x18] sm:$0xff]  ;;  %v962_v9 = vld [vmem:[%s2592_s9 + $0x8] sm:$0xff] }
  0x27   : > { %v478_v54 = vsel %vm458_vm0, %v430_v51, 0  ;;  %v1632_v10 = vld [vmem:[%s2592_s9] sm:$0xff]  ;;  %v963_v11 = vld [vmem:[%s2592_s9 + $0x10] sm:$0xff]  ;;  %v964_v12 = vld [vmem:[%s2592_s9 + $0x18] sm:$0xff] }
  0x28   : > { %v481_v62 = vsel %vm458_vm0, %v431_v58, 0  ;;  %v1011_v13 = vld [vmem:[#allocation2] sm:$0x1]  ;;  %v566_v14 = vld [vmem:[%s2587_s4 + $0x18] sm:$0xff]  ;;  %v678_v15 = vld [vmem:[%s2589_s6 + $0x8] sm:$0xff] }
  0x29   : > { %1859 = vmatpush3.bf16.xpose.msra.mxu0 %v466_v27  ;;  %v680_v16 = vld [vmem:[%s2589_s6 + $0x18] sm:$0xff]  ;;  %v682_v17 = vld [vmem:[%s2589_s6 + $0x28] sm:$0xff]  ;;  %v1682_v20 = vld [vmem:[#allocation2] sm:$0x1] }
  0x2a   : > { %1896 = vmatprep.subr.msk.bf16.mxu0 %vm458_vm0, %v435_v28  ;;  %717 = vperm.xlu0 %1951, %v683_v33   ;;  %v684_v18 = vld [vmem:[%s2589_s6 + $0x38] sm:$0xff]  ;;  %v1955_v37 = vld [vmem:[%s2586_s3 + $0x8] sm:$0xff]  }
  0x2e   : > { %1120 = vperm.xlu0 %1951, %v441_v1   ;;  %v406_v1 = vld [vmem:[%s2190_s13 + $0x78] sm:$0xff] }
  0x31   : > { %1861 = vmatpush3.bf16.xpose.msra.mxu0 %v469_v30 }
  0x32   : > { %1897 = vmatprep.subr.msk.bf16.mxu0 %vm458_vm0, %v436_v36  ;;  %1243 = vperm.xlu0 %1951, %v1237_v5   ;;  %v432_v5 = vpack.c.bf16 %v406_v1, %v405_v0  ;;  %v1954_v36 = vld [vmem:[%s2586_s3] sm:$0xff]  }
  0x34   : > { %v484_v7 = vsel %vm458_vm0, %v432_v5, 0 }
  0x36   : > { %1253 = vperm.xlu0 %1951, %v565_v6   ;;  %v861_v6 = vld [vmem:[%s2591_s8 + $0x10] sm:$0xff] }
  0x39   : > { %1863 = vmatpush3.bf16.xpose.msra.mxu0 %v472_v40 }
  0x3a   : > { %1898 = vmatprep.subr.msk.bf16.mxu0 %vm458_vm0, %v437_v41  ;;  %1360 = vperm.xlu0 %1951, %v677_v19   ;;  %v860_v19 = vld [vmem:[%s2591_s8 + $0x8] sm:$0xff] }
  0x3e   : > { %1370 = vperm.xlu0 %1951, %v679_v25  }
  0x41   : > { %1865 = vmatpush3.bf16.xpose.msra.mxu0 %v475_v47 }
  0x42   : > { %1899 = vmatprep.subr.msk.bf16.mxu0 %vm458_vm0, %v438_v48  ;;  %1380 = vperm.xlu0 %1951, %v681_v29  }
  0x46   : > { %1390 = vperm.xlu0 %1951, %v683_v33  }
  0x49   : > { %1867 = vmatpush3.bf16.xpose.msra.mxu0 %v478_v54 }
  0x4a   : > { %1900 = vmatprep.subr.msk.bf16.mxu0 %vm458_vm0, %v439_v55  ;;  %865 = vperm.xlu0 %1951, %v859_v61  }
  0x4e   : > { %1537 = vperm.xlu0 %1951, %v859_v61  }
  0x51   : > { %1869 = vmatpush3.bf16.xpose.msra.mxu0 %v481_v62 }
  0x52   : > { %1901 = vmatprep.subr.msk.bf16.mxu0 %vm458_vm0, %v440_v63  ;;  %875 = vperm.xlu0 %1951, %v861_v6  }
  0x56   : > { %880 = vperm.xlu0 %1951, %v862_v8  }
  0x59   : > { %1871 = vmatpush3.bf16.xpose.msra.mxu0 %v484_v7 }
  0x5a   : > { %972 = vperm.xlu0 %1951, %v962_v9  }
  0x5e   : > { %1638 = vperm.xlu0 %1951, %v1632_v10  }
  0x60   : > { %1873 = vmatmul.mubr.msk.bf16.vlgmr.msra.gmra.mrb[0].mxu0 %vm458_vm0, %v2170_v2  ;;  %v564_v2 = vld [vmem:[%s2587_s4 + $0x8] sm:$0xff] }
  0x61   : > { %1309 = vmatprep.mubr.bf16.mxu0 %v2051_v3  ;;  %574 = vperm.xlu1 %1952, %v564_v2  }
  0x62   : > { %977 = vperm.xlu0 %1951, %v963_v11  }
  0x65   : > { %584 = vperm.xlu1 %1952, %v566_v14  }
  0x66   : > { %982 = vperm.xlu0 %1951, %v964_v12  }
  0x69   : > { %692 = vperm.xlu1 %1952, %v678_v15  }
  0x6a   : > { %1014 = vperm.xlu0 %1951, %v1011_v13  }
  0x6d   : > { %702 = vperm.xlu1 %1952, %v680_v16  }
  0x71   : > { %712 = vperm.xlu1 %1952, %v682_v17  }
  0x75   : > { %722 = vperm.xlu1 %1952, %v684_v18  }
  0x79   : > { %1125 = vperm.xlu1 %1952, %v2181_v4  }
  0x7d   : > { %1248 = vperm.xlu1 %1952, %v564_v2  }
  0x81   : > { %1258 = vperm.xlu1 %1952, %v566_v14  }
  0x85   : > { %1365 = vperm.xlu1 %1952, %v678_v15  }
  0x89   : > { %1375 = vperm.xlu1 %1952, %v680_v16  }
  0x8d   : > { %1385 = vperm.xlu1 %1952, %v682_v17  }
  0x91   : > { %1395 = vperm.xlu1 %1952, %v684_v18   ;;  %v446_v4 = vpop.permute.xlu0 %445 }
  0x92   : > { %v570_v38 = vpop.permute.xlu1 %569 }
  0x95   : > { %870 = vperm.xlu1 %1952, %v860_v19   ;;  %v451_v24 = vpop.permute.xlu0 %450 }
  0x99   : > { %1542 = vperm.xlu1 %1952, %v860_v19   ;;  %v580_v53 = vpop.permute.xlu0 %579 }
  0x9d   : > { %1547 = vperm.xlu1 %1952, %v861_v6   ;;  %v688_v13 = vpop.permute.xlu0 %687 }
  0xa1   : > { %967 = vperm.xlu1 %1952, %v1632_v10   ;;  %v1957_v10 = vld [vmem:[%s2588_s5 + $0x8] sm:$0xff]  }
  0xa5   : > { %1552 = vperm.xlu1 %1952, %v862_v8  }
  0xa9   : > { %1643 = vperm.xlu1 %1952, %v962_v9   ;;  %v1956_v9 = vld [vmem:[%s2588_s5] sm:$0xff]  }
  0xad   : > { %1648 = vperm.xlu1 %1952, %v963_v11   ;;  %v1958_v11 = vld [vmem:[%s2588_s5 + $0x10] sm:$0xff]  }
  0xb1   : > { %1653 = vperm.xlu1 %1952, %v964_v12   ;;  %v1959_v12 = vld [vmem:[%s2588_s5 + $0x18] sm:$0xff]  }
  0xb5   : > { %1685 = vperm.xlu1 %1952, %v1682_v20  }
  0xe0   : > { %v575_v42 = vpop.permute.xlu1 %574 }
  0xe4   : > { %v585_v58 = vpop.permute.xlu1 %584 }
  0xe8   : > { %v693_v16 = vpop.permute.xlu1 %692 }
 0x133   : > { %v544_v21 = vpop.f32.mrb[0].mxu0 }
 0x134   : > { %v545_v22 = vadd.f32 %v544_v21, %v446_v4  ;;  %v546_v23 = vpop.f32.mrb[1].mxu0 }
 0x135   : > { %v547_v25 = vadd.f32 %v546_v23, %v446_v4  ;;  %v548_v26 = vpop.f32.mrb[2].mxu0 }
 0x136   : > { %v549_v27 = vadd.f32 %v548_v26, %v451_v24  ;;  %v550_v28 = vpop.f32.mrb[3].mxu0  ;;  %v553_v30 = vmax.f32 %v545_v22, 0.0  ;;  %v698_v26 = vpop.permute.xlu0 %697 }
 0x137   : > { %v551_v29 = vadd.f32 %v550_v28, %v451_v24  ;;  %v554_v32 = vmax.f32 %v547_v25, 0.0 }
 0x138   : > { %v555_v31 = vmax.f32 %v549_v27, 0.0 }
 0x139   : > { %v556_v33 = vmax.f32 %v551_v29, 0.0 }
 0x13a   : > { %v561_v34 = vpack.c.bf16 %v555_v31, %v553_v30  ;;  %v703_v31 = vpop.permute.xlu1 %702 }
 0x13b   : > { %v562_v35 = vpack.c.bf16 %v556_v33, %v554_v32 }
 0x13d   : > { %604 = vmatprep.subr.bf16.mxu1 %v562_v35 }
 0x13e   : > { %605 = vmatpush1.bf16.msra.mxu1 %v561_v34 }
 0x141   : > { %1818 = vmatmul.mubr.msk.bf16.vlgmr.msra.gmra.mrb[0].mxu1 %vm597_vm1, %v1954_v36 }
 0x142   : > { %646 = vmatprep.mubr.bf16.mxu1 %v2051_v3 }
 0x149   : > { %1819 = vmatmul.mubr.msk.bf16.gmra.mrb[4].mxu1 %vm597_vm1, %v1955_v37 }
 0x14a   : > { %790 = vmatprep.mubr.bf16.mxu1 %v2051_v3 }
 0x214   : > { %v638_v39 = vpop.f32.mrb[0].mxu1 }
 0x215   : > { %v639_v40 = vadd.f32 %v638_v39, %v570_v38  ;;  %v640_v41 = vpop.f32.mrb[1].mxu1 }
 0x216   : > { %v641_v43 = vadd.f32 %v640_v41, %v570_v38  ;;  %v642_v44 = vpop.f32.mrb[2].mxu1 }
 0x217   : > { %v643_v45 = vadd.f32 %v642_v44, %v575_v42  ;;  %v644_v46 = vpop.f32.mrb[3].mxu1  ;;  %v657_v48 = vmax.f32 %v639_v40, 0.0 }
 0x218   : > { %v645_v47 = vadd.f32 %v644_v46, %v575_v42  ;;  %v658_v50 = vmax.f32 %v641_v43, 0.0  ;;  %v708_v42 = vpop.permute.xlu0 %707 }
 0x219   : > { %v659_v49 = vmax.f32 %v643_v45, 0.0 }
 0x21a   : > { %v660_v51 = vmax.f32 %v645_v47, 0.0  ;;  %v713_v47 = vpop.permute.xlu1 %712 }
 0x21b   : > { %v673_v52 = vpack.c.bf16 %v659_v49, %v657_v48 }
 0x21c   : > { %v674_v54 = vpack.c.bf16 %v660_v51, %v658_v50  ;;  %v648_v55 = vpop.f32.mrb[4].mxu1 }
 0x21d   : > { %v649_v56 = vadd.f32 %v648_v55, %v580_v53  ;;  %v650_v57 = vpop.f32.mrb[5].mxu1 }
 0x21e   : > { %v651_v59 = vadd.f32 %v650_v57, %v580_v53  ;;  %v652_v60 = vpop.f32.mrb[6].mxu1  ;;  %758 = vmatprep.subr.bf16.mxu1 %v674_v54 }
 0x21f   : > { %v653_v61 = vadd.f32 %v652_v60, %v585_v58  ;;  %v654_v62 = vpop.f32.mrb[7].mxu1  ;;  %759 = vmatpush1.bf16.msra.mxu1 %v673_v52  ;;  %v661_v0 = vmax.f32 %v649_v56, 0.0 }
 0x220   : > { %v655_v63 = vadd.f32 %v654_v62, %v585_v58  ;;  %v662_v5 = vmax.f32 %v651_v59, 0.0  ;;  %v718_v58 = vpop.permute.xlu0 %717 }
 0x221   : > { %v663_v1 = vmax.f32 %v653_v61, 0.0 }
 0x222   : > { %v664_v6 = vmax.f32 %v655_v63, 0.0  ;;  %v723_v63 = vpop.permute.xlu1 %722 }
 0x223   : > { %v675_v7 = vpack.c.bf16 %v663_v1, %v661_v0 }
 0x224   : > { %v676_v8 = vpack.c.bf16 %v664_v6, %v662_v5 }
 0x226   : > { %760 = vmatprep.subr.bf16.mxu1 %v676_v8 }
 0x227   : > { %761 = vmatpush1.bf16.msra.mxu1 %v675_v7 }
 0x22a   : > { %1824 = vmatmul.mubr.msk.bf16.vlgmr.msra.gmra.mrb[8].mxu1 %vm745_vm2, %v1956_v9 }
 0x22b   : > { %800 = vmatprep.mubr.bf16.mxu1 %v2051_v3 }
 0x232   : > { %1825 = vmatmul.mubr.msk.bf16.gmra.mrb[12].mxu1 %vm745_vm2, %v1957_v10  ;;  %v1082_v10 = vld [vmem:[%s2190_s13 + $0x180] sm:$0xff] }
 0x233   : > { %810 = vmatprep.mubr.bf16.mxu1 %v2051_v3 }
 0x23a   : > { %1826 = vmatmul.mubr.msk.bf16.gmra.mrb[16].mxu1 %vm745_vm2, %v1958_v11  ;;  %v1083_v11 = vld [vmem:[%s2190_s13 + $0x188] sm:$0xff] }
 0x23b   : > { %820 = vmatprep.mubr.bf16.mxu1 %v2051_v3 }
 0x242   : > { %1827 = vmatmul.mubr.msk.bf16.gmra.mrb[20].mxu1 %vm745_vm2, %v1959_v12 }
 0x243   : > { %932 = vmatprep.mubr.bf16.mxu1 %v2051_v3 }
 0x2fd   : > { %v792_v2 = vpop.f32.mrb[8].mxu1 }
 0x2fe   : > { %v793_v14 = vadd.f32 %v792_v2, %v688_v13  ;;  %v794_v15 = vpop.f32.mrb[9].mxu1 }
 0x2ff   : > { %v795_v17 = vadd.f32 %v794_v15, %v688_v13  ;;  %v796_v18 = vpop.f32.mrb[10].mxu1  ;;  %v1108_v15 = vpack.c.bf16 %v1083_v11, %v1082_v10  ;;  %v2395_v10 = vpop.permute.xlu0 %1120 }
 0x300   : > { %v797_v19 = vadd.f32 %v796_v18, %v693_v16  ;;  %v798_v20 = vpop.f32.mrb[11].mxu1  ;;  %v831_v21 = vmax.f32 %v793_v14, 0.0  ;;  %v1067_v18 = vld [vmem:[%s2190_s13 + $0x108] sm:$0xff] }
 0x301   : > { %v799_v4 = vadd.f32 %v798_v20, %v693_v16  ;;  %v832_v23 = vmax.f32 %v795_v17, 0.0  ;;  %v1960_v16 = vld [vmem:[%s2590_s7] sm:$0xff]   ;;  %v1084_v20 = vld [vmem:[%s2190_s13 + $0x190] sm:$0xff] }
 0x302   : > { %v833_v22 = vmax.f32 %v797_v19, 0.0  ;;  %v1066_v17 = vld [vmem:[%s2190_s13 + $0x100] sm:$0xff] }
 0x303   : > { %v834_v24 = vmax.f32 %v799_v4, 0.0  ;;  %v1100_v19 = vpack.c.bf16 %v1067_v18, %v1066_v17  ;;  %v1085_v4 = vld [vmem:[%s2190_s13 + $0x198] sm:$0xff]  ;;  %v2397_v11 = vpop.permute.xlu0 %1243 }
 0x304   : > { %v851_v25 = vpack.c.bf16 %v833_v22, %v831_v21  ;;  %v1109_v22 = vpack.c.bf16 %v1085_v4, %v1084_v20 }
 0x305   : > { %v852_v27 = vpack.c.bf16 %v834_v24, %v832_v23  ;;  %v802_v28 = vpop.f32.mrb[12].mxu1  ;;  %v1137_v21 = vsel %vm458_vm0, %v1100_v19, 0  ;;  %v1961_v23 = vld [vmem:[%s2590_s7 + $0x8] sm:$0xff]   ;;  %v1068_v24 = vld [vmem:[%s2190_s13 + $0x110] sm:$0xff] }
 0x306   : > { %v803_v29 = vadd.f32 %v802_v28, %v698_v26  ;;  %v804_v30 = vpop.f32.mrb[13].mxu1  ;;  %v1086_v28 = vld [vmem:[%s2190_s13 + $0x1a0] sm:$0xff] }
 0x307   : > { %v805_v32 = vadd.f32 %v804_v30, %v698_v26  ;;  %v806_v33 = vpop.f32.mrb[14].mxu1  ;;  %900 = vmatprep.subr.bf16.mxu1 %v852_v27  ;;  %v1962_v26 = vld [vmem:[%s2584_s1] sm:$0xff]  }
 0x308   : > { %v807_v34 = vadd.f32 %v806_v33, %v703_v31  ;;  %v808_v35 = vpop.f32.mrb[15].mxu1  ;;  %901 = vmatpush1.bf16.msra.mxu1 %v851_v25  ;;  %v835_v37 = vmax.f32 %v803_v29, 0.0  ;;  %v1069_v25 = vld [vmem:[%s2190_s13 + $0x118] sm:$0xff]  ;;  %v1087_v29 = vld [vmem:[%s2190_s13 + $0x1a8] sm:$0xff] }
 0x309   : > { %v809_v36 = vadd.f32 %v808_v35, %v703_v31  ;;  %v836_v39 = vmax.f32 %v805_v32, 0.0  ;;  %v1101_v27 = vpack.c.bf16 %v1069_v25, %v1068_v24  ;;  %v1110_v31 = vpack.c.bf16 %v1087_v29, %v1086_v28  ;;  %v1070_v32 = vld [vmem:[%s2190_s13 + $0x120] sm:$0xff]  ;;  %v1071_v33 = vld [vmem:[%s2190_s13 + $0x128] sm:$0xff]  ;;  %v1088_v35 = vld [vmem:[%s2190_s13 + $0x1b0] sm:$0xff] }
 0x30a   : > { %v837_v38 = vmax.f32 %v807_v34, 0.0  ;;  %v1102_v34 = vpack.c.bf16 %v1071_v33, %v1070_v32 }
 0x30b   : > { %v838_v40 = vmax.f32 %v809_v36, 0.0  ;;  %v1140_v30 = vsel %vm458_vm0, %v1101_v27, 0  ;;  %v1089_v36 = vld [vmem:[%s2190_s13 + $0x1b8] sm:$0xff] }
 0x30c   : > { %v853_v41 = vpack.c.bf16 %v837_v38, %v835_v37  ;;  %v1143_v37 = vsel %vm458_vm0, %v1102_v34, 0  ;;  %v1111_v38 = vpack.c.bf16 %v1089_v36, %v1088_v35 }
 0x30d   : > { %v854_v43 = vpack.c.bf16 %v838_v40, %v836_v39  ;;  %v812_v44 = vpop.f32.mrb[16].mxu1  ;;  %v1072_v39 = vld [vmem:[%s2190_s13 + $0x130] sm:$0xff]  ;;  %v1073_v40 = vld [vmem:[%s2190_s13 + $0x138] sm:$0xff] }
 0x30e   : > { %v813_v45 = vadd.f32 %v812_v44, %v708_v42  ;;  %v814_v46 = vpop.f32.mrb[17].mxu1 }
 0x30f   : > { %v815_v48 = vadd.f32 %v814_v46, %v708_v42  ;;  %v816_v49 = vpop.f32.mrb[18].mxu1  ;;  %902 = vmatprep.subr.bf16.mxu1 %v854_v43  ;;  %v1090_v42 = vld [vmem:[%s2190_s13 + $0x1c0] sm:$0xff]  ;;  %v1091_v43 = vld [vmem:[%s2190_s13 + $0x1c8] sm:$0xff] }
 0x310   : > { %v817_v50 = vadd.f32 %v816_v49, %v713_v47  ;;  %v818_v51 = vpop.f32.mrb[19].mxu1  ;;  %903 = vmatpush1.bf16.msra.mxu1 %v853_v41  ;;  %v839_v53 = vmax.f32 %v813_v45, 0.0  ;;  %v1103_v41 = vpack.c.bf16 %v1073_v40, %v1072_v39  ;;  %v1112_v45 = vpack.c.bf16 %v1091_v43, %v1090_v42  ;;  %v1074_v46 = vld [vmem:[%s2190_s13 + $0x140] sm:$0xff]  ;;  %v1092_v49 = vld [vmem:[%s2190_s13 + $0x1d0] sm:$0xff] }
 0x311   : > { %v819_v52 = vadd.f32 %v818_v51, %v713_v47  ;;  %v840_v55 = vmax.f32 %v815_v48, 0.0  ;;  %v1075_v47 = vld [vmem:[%s2190_s13 + $0x148] sm:$0xff] }
 0x312   : > { %v841_v54 = vmax.f32 %v817_v50, 0.0  ;;  %v1146_v44 = vsel %vm458_vm0, %v1103_v41, 0  ;;  %v1104_v48 = vpack.c.bf16 %v1075_v47, %v1074_v46  ;;  %v1093_v50 = vld [vmem:[%s2190_s13 + $0x1d8] sm:$0xff] }
 0x313   : > { %v842_v56 = vmax.f32 %v819_v52, 0.0  ;;  %v1113_v52 = vpack.c.bf16 %v1093_v50, %v1092_v49 }
 0x314   : > { %v855_v57 = vpack.c.bf16 %v841_v54, %v839_v53  ;;  %v1149_v51 = vsel %vm458_vm0, %v1104_v48, 0  ;;  %v1076_v53 = vld [vmem:[%s2190_s13 + $0x150] sm:$0xff]  ;;  %v1077_v54 = vld [vmem:[%s2190_s13 + $0x158] sm:$0xff] }
 0x315   : > { %v856_v59 = vpack.c.bf16 %v842_v56, %v840_v55  ;;  %v822_v60 = vpop.f32.mrb[20].mxu1  ;;  %v1105_v55 = vpack.c.bf16 %v1077_v54, %v1076_v53  ;;  %v1094_v56 = vld [vmem:[%s2190_s13 + $0x1e0] sm:$0xff] }
 0x316   : > { %v823_v61 = vadd.f32 %v822_v60, %v718_v58  ;;  %v824_v62 = vpop.f32.mrb[21].mxu1  ;;  %v1078_v60 = vld [vmem:[%s2190_s13 + $0x160] sm:$0xff] }
 0x317   : > { %v825_v0 = vadd.f32 %v824_v62, %v718_v58  ;;  %v826_v1 = vpop.f32.mrb[22].mxu1  ;;  %904 = vmatprep.subr.bf16.mxu1 %v856_v59  ;;  %v1152_v58 = vsel %vm458_vm0, %v1105_v55, 0 }
 0x318   : > { %v827_v5 = vadd.f32 %v826_v1, %v723_v63  ;;  %v828_v6 = vpop.f32.mrb[23].mxu1  ;;  %905 = vmatpush1.bf16.msra.mxu1 %v855_v57  ;;  %v843_v8 = vmax.f32 %v823_v61, 0.0  ;;  %v1095_v57 = vld [vmem:[%s2190_s13 + $0x1e8] sm:$0xff] }
 0x319   : > { %v829_v7 = vadd.f32 %v828_v6, %v723_v63  ;;  %v844_v12 = vmax.f32 %v825_v0, 0.0  ;;  %v1114_v59 = vpack.c.bf16 %v1095_v57, %v1094_v56  ;;  %v1079_v61 = vld [vmem:[%s2190_s13 + $0x168] sm:$0xff]  ;;  %v1096_v63 = vld [vmem:[%s2190_s13 + $0x1f0] sm:$0xff]  ;;  %v1097_v0 = vld [vmem:[%s2190_s13 + $0x1f8] sm:$0xff] }
 0x31a   : > { %v845_v9 = vmax.f32 %v827_v5, 0.0  ;;  %v1106_v62 = vpack.c.bf16 %v1079_v61, %v1078_v60  ;;  %v1115_v5 = vpack.c.bf16 %v1097_v0, %v1096_v63  ;;  %v1080_v6 = vld [vmem:[%s2190_s13 + $0x170] sm:$0xff] }
 0x31b   : > { %v846_v13 = vmax.f32 %v829_v7, 0.0  ;;  %v1081_v7 = vld [vmem:[%s2190_s13 + $0x178] sm:$0xff]  ;;  %s380_s13 = sand.u32 1, %s2041_s20  }
 0x31c   : > { %v857_v2 = vpack.c.bf16 %v845_v9, %v843_v8  ;;  %v1155_v1 = vsel %vm458_vm0, %v1106_v62, 0  ;;  %v1107_v8 = vpack.c.bf16 %v1081_v7, %v1080_v6  ;;  %s1811_s23 = sshll.u32 %s380_s13, 2  ;;  %s1734_s14 = scalar_lea.sflag [#allocation4], %s380_s13 }
 0x31d   : > { %v858_v14 = vpack.c.bf16 %v846_v13, %v844_v12  ;;  %v2399_v12 = vpop.permute.xlu0 %1253  ;;  %v2401_v13 = vpop.permute.xlu1 %1125  ;;  %s2452_s25 = scalar_lea.vmem [#allocation3], %s1811_s23 }
 0x31e   : > { %v1158_v9 = vsel %vm458_vm0, %v1107_v8, 0  ;;  %s1748_s10 = sshll.u32 %s2452_s25, 4  ;;  %s2538_s10 = int_to_ptr.vmem [resolvable:$true] %s1748_s10 }
 0x31f   : > { %906 = vmatprep.subr.bf16.mxu1 %v858_v14  ;;  %s1987_s15 = scalar_lea.vmem %s2538_s10, 64  ;;  %p1994_p0 = scmp.lt.s32.totalorder %s2538_s10, %s1992_s17 }
 0x320   : > { %907 = vmatpush1.bf16.msra.mxu1 %v857_v2  ;;  %p1988_p11 = scmp.ne.s32.totalorder %s2538_s10, %s1987_s15  ;;  %p1995_p1 = scmp.lt.s32.totalorder %s1993_s30, %s1987_s15 }
 0x321   : > { %1902 = vmatprep.subr.msk.bf16.mxu1 %vm458_vm0, %v1108_v15  ;;  %v2403_v2 = vpop.permute.xlu0 %1360  ;;  %v2405_v14 = vpop.permute.xlu1 %1248 }
 0x322   : > { %p1989_p12 = pnand %p1988_p11, %p2152_p5  ;;  %p1996_p2 = por %p1995_p1, %p1994_p0 }
 0x323   : > { %1830 = vmatmul.mubr.msk.bf16.vlgmr.msra.gmra.mrb[24].mxu1 %vm893_vm3, %v1960_v16 }
 0x324   : > { %942 = vmatprep.mubr.bf16.mxu1 %v2051_v3  ;;  %p1990_p13 = pneg %p1989_p12 }
 0x325   : > { %v2407_v15 = vpop.permute.xlu0 %1370  ;;  %v2409_v16 = vpop.permute.xlu1 %1258 }
 0x326   : > { %p1997_p3 = pnand %p1996_p2, %p1990_p13 }
 0x329   : > { %1875 = vmatpush3.bf16.xpose.msra.mxu1 %v1137_v21  ;;  %v2411_v17 = vpop.permute.xlu0 %1380  ;;  %v2413_v18 = vpop.permute.xlu1 %1365 }
 0x32a   : > { %1903 = vmatprep.subr.msk.bf16.mxu1 %vm458_vm0, %v1109_v22 }
 0x32b   : > { %1831 = vmatmul.mubr.msk.bf16.gmra.mrb[28].mxu1 %vm893_vm3, %v1961_v23 }
 0x32c   : > { %1890 = vmatprep.mubr.msk.bf16.mxu1 %vm458_vm0, %v1962_v26 }
 0x32d   : > { %v2415_v19 = vpop.permute.xlu0 %1390  ;;  %v2417_v20 = vpop.permute.xlu1 %1375 }
 0x331   : > { %1877 = vmatpush3.bf16.xpose.msra.mxu1 %v1140_v30  ;;  %v866_v4 = vpop.permute.xlu0 %865  ;;  %v2419_v21 = vpop.permute.xlu1 %1385 }
 0x332   : > { %1904 = vmatprep.subr.msk.bf16.mxu1 %vm458_vm0, %v1110_v31 }
 0x335   : > { %v2421_v22 = vpop.permute.xlu0 %1537  ;;  %v2423_v23 = vpop.permute.xlu1 %1395 }
 0x339   : > { %1879 = vmatpush3.bf16.xpose.msra.mxu1 %v1143_v37  ;;  %v876_v24 = vpop.permute.xlu0 %875  ;;  %v871_v25 = vpop.permute.xlu1 %870 }
 0x33a   : > { %1905 = vmatprep.subr.msk.bf16.mxu1 %vm458_vm0, %v1111_v38 }
 0x33d   : > { %v2425_v27 = vpop.permute.xlu1 %1542 }
 0x341   : > { %1881 = vmatpush3.bf16.xpose.msra.mxu1 %v1146_v44  ;;  %v2427_v29 = vpop.permute.xlu1 %1547 }
 0x342   : > { %1906 = vmatprep.subr.msk.bf16.mxu1 %vm458_vm0, %v1112_v45 }
 0x345   : > { %v968_v42 = vpop.permute.xlu1 %967 }
 0x349   : > { %1883 = vmatpush3.bf16.xpose.msra.mxu1 %v1149_v51 }
 0x34a   : > { %1907 = vmatprep.subr.msk.bf16.mxu1 %vm458_vm0, %v1113_v52 }
 0x351   : > { %1885 = vmatpush3.bf16.xpose.msra.mxu1 %v1152_v58 }
 0x352   : > { %1908 = vmatprep.subr.msk.bf16.mxu1 %vm458_vm0, %v1114_v59 }
 0x359   : > { %1887 = vmatpush3.bf16.xpose.msra.mxu1 %v1155_v1 }
 0x35a   : > { %1909 = vmatprep.subr.msk.bf16.mxu1 %vm458_vm0, %v1115_v5 }
 0x361   : > { %1889 = vmatpush3.bf16.xpose.msra.mxu1 %v1158_v9  ;;  %v1017_v9 = vlaneseq }
 0x363   : > { %vm2444_vm6 = vcmp.lt.s32.totalorder %v1017_v9, 256 }
 0x368   : > { %1891 = vmatmul.mubr.msk.bf16.vlgmr.msra.gmra.mrb[32].mxu1 %vm458_vm0, %v1962_v26  ;;  %v881_v26 = vpop.permute.xlu0 %880 }
 0x369   : > { %1319 = vmatprep.mubr.bf16.mxu1 %v2051_v3 }
 0x36c   : > { %v973_v28 = vpop.permute.xlu0 %972 }
 0x370   : > { %v2429_v33 = vpop.permute.xlu0 %1638 }
 0x374   : > { %v978_v46 = vpop.permute.xlu0 %977 }
 0x378   : > { %v983_v63 = vpop.permute.xlu0 %982 }
 0x3f6   : > { %v934_v30 = vpop.f32.mrb[24].mxu1 }
 0x3f7   : > { %v935_v31 = vadd.f32 %v934_v30, %v866_v4  ;;  %v936_v32 = vpop.f32.mrb[25].mxu1  ;;  %v2431_v30 = vshrl.u32 %v1017_v9, 7 }
 0x3f8   : > { %v937_v34 = vadd.f32 %v936_v32, %v866_v4  ;;  %v938_v35 = vpop.f32.mrb[26].mxu1 }
 0x3f9   : > { %v953_v36 = vmax.f32 %v935_v31, 0.0  ;;  %v939_v37 = vadd.f32 %v938_v35, %v871_v25  ;;  %v940_v38 = vpop.f32.mrb[27].mxu1  ;;  %v1019_v35 = vsub.s32 0, %v2431_v30 }
 0x3fa   : > { %v954_v39 = vmax.f32 %v937_v34, 0.0  ;;  %v941_v40 = vadd.f32 %v940_v38, %v871_v25 }
 0x3fb   : > { %v955_v41 = vmax.f32 %v939_v37, 0.0  ;;  %v985_v44 = vmul.f32 %v968_v42, %v953_v36  ;;  %v1015_v37 = vpop.permute.xlu0 %1014 }
 0x3fc   : > { %v956_v43 = vmax.f32 %v941_v40, 0.0  ;;  %v986_v47 = vmul.f32 %v968_v42, %v954_v39 }
 0x3fd   : > { %v987_v45 = vmul.f32 %v973_v28, %v955_v41  ;;  %v1020_v41 = vrot.slane %v1015_v37, %v1019_v35 }
 0x3fe   : > { %v988_v48 = vmul.f32 %v973_v28, %v956_v43  ;;  %v944_v49 = vpop.f32.mrb[28].mxu1 }
 0x3ff   : > { %v993_v50 = vadd.f32 %v987_v45, %v985_v44  ;;  %v945_v51 = vadd.f32 %v944_v49, %v876_v24  ;;  %v946_v52 = vpop.f32.mrb[29].mxu1 }
 0x400   : > { %v1002_v53 = vadd.f32 %v988_v48, %v986_v47  ;;  %v947_v54 = vadd.f32 %v946_v52, %v876_v24  ;;  %v948_v55 = vpop.f32.mrb[30].mxu1 }
 0x401   : > { %v957_v56 = vmax.f32 %v945_v51, 0.0  ;;  %v949_v57 = vadd.f32 %v948_v55, %v881_v26  ;;  %v950_v58 = vpop.f32.mrb[31].mxu1 }
 0x402   : > { %v958_v59 = vmax.f32 %v947_v54, 0.0  ;;  %v951_v60 = vadd.f32 %v950_v58, %v881_v26 }
 0x403   : > { %v989_v61 = vmul.f32 %v978_v46, %v957_v56  ;;  %v959_v62 = vmax.f32 %v949_v57, 0.0  ;;  %v2052_v56 = vmov 1966171168  }
 0x404   : > { %v990_v0 = vmul.f32 %v978_v46, %v958_v59  ;;  %v960_v1 = vmax.f32 %v951_v60, 0.0  ;;  %v1047_v57 = vunpack.c.l.s4 %v2052_v56 }
 0x405   : > { %v994_v5 = vadd.f32 %v993_v50, %v989_v61  ;;  %v991_v6 = vmul.f32 %v983_v63, %v959_v62 }
 0x406   : > { %v1003_v7 = vadd.f32 %v1002_v53, %v990_v0  ;;  %v992_v8 = vmul.f32 %v983_v63, %v960_v1  ;;  %v1048_v58 = vunpack.c.0.s8 %v1047_v57 }
 0x407   : > { %v995_v4 = vadd.f32 %v994_v5, %v991_v6 }
 0x408   : > { %v1004_v25 = vadd.f32 %v1003_v7, %v992_v8  ;;  %v2438_v63 = vsub.s32 %v1048_v58, %v2431_v30 }
 0x409   : > { %v996_v28 = vrot.slane %v995_v4, 4 }
 0x40a   : > { %v1005_v24 = vrot.slane %v1004_v25, 4 }
 0x40b   : > { %v997_v31 = vadd.f32 %v996_v28, %v995_v4 }
 0x40c   : > { %v1006_v32 = vadd.f32 %v1005_v24, %v1004_v25 }
 0x40d   : > { %v998_v34 = vrot.slane %v997_v31, 2 }
 0x40e   : > { %v1007_v26 = vrot.slane %v1006_v32, 2 }
 0x40f   : > { %v999_v36 = vadd.f32 %v998_v34, %v997_v31 }
 0x410   : > { %v1008_v38 = vadd.f32 %v1007_v26, %v1006_v32 }
 0x411   : > { %v1000_v39 = vrot.slane %v999_v36, 1 }
 0x412   : > { %v1009_v40 = vrot.slane %v1008_v38, 1 }
 0x413   : > { %v1001_v42 = vadd.f32 %v1000_v39, %v999_v36 }
 0x414   : > { %v1010_v43 = vadd.f32 %v1009_v40, %v1008_v38  ;;  %v1963_v40 = vld [vmem:[%s2586_s3] sm:$0xff]  }
 0x415   : > { %v1021_v44 = vadd.f32 %v1020_v41, %v1001_v42 }
 0x416   : > { %v1022_v45 = vadd.f32 %v1020_v41, %v1010_v43 }
 0x417   : > { %v1023_v46 = vand.u32 2147483647, %v1021_v44  ;;  %vm1037_vm4 = vcmp.ge.f32.partialorder %v1021_v44, 0.0 }
 0x418   : > { %v1024_v47 = vand.u32 2147483647, %v1022_v45  ;;  %vm1038_vm5 = vcmp.ge.f32.partialorder %v1022_v45, 0.0 }
 0x419   : > { %v1025_v48 = vsub.f32 0.0, %v1023_v46 }
 0x41a   : > { %v1026_v49 = vsub.f32 0.0, %v1024_v47 }
 0x41b   : > { %v1027_v50 = vmul.f32 1.442695, %v1025_v48 }
 0x41c   : > { %v1029_v51 = vmul.f32 1.442695, %v1026_v49 }
 0x41d   : > { %1971 = vpow2.f32 %v1027_v50 }
 0x41e   : > { %1973 = vpow2.f32 %v1029_v51 }
 0x427   : > { %v1972_v52 = vpop.eup %1971 }
 0x428   : > { %v1974_v53 = vpop.eup %1973  ;;  %v1031_v54 = vadd.f32 1.0, %v1972_v52 }
 0x429   : > { %v1032_v55 = vadd.f32 1.0, %v1974_v53 }
 0x42a   : > { %1975 = vrcp.f32 %v1031_v54 }
 0x42b   : > { %1977 = vrcp.f32 %v1032_v55 }
 0x434   : > { %v1976_v59 = vpop.eup %1975 }
 0x435   : > { %v1978_v60 = vpop.eup %1977  ;;  %v1039_v61 = vmul.f32 %v1976_v59, %v1972_v52 }
 0x436   : > { %v1040_v62 = vmul.f32 %v1978_v60, %v1974_v53 }
 0x437   : > { %v1041_v0 = vsel %vm1037_vm4, %v1976_v59, %v1039_v61 }
 0x438   : > { %v1042_v1 = vsel %vm1038_vm5, %v1978_v60, %v1040_v62 }
 0x439   : > { %v1045_v5 = vcombine.low %v1041_v0, %v1042_v1 }
 0x43b   : > { %v1218_v6 = vpop.f32.mrb[32].mxu1  ;;  %v1052_v7 = vrot.slane %v1045_v5, %v2438_v63 }
 0x43c   : > { %v1219_v8 = vadd.f32 %v1218_v6, %v2395_v10  ;;  %v1220_v4 = vpop.f32.mrb[33].mxu1 }
 0x43d   : > { %v1221_v28 = vadd.f32 %v1220_v4, %v2395_v10  ;;  %v1222_v24 = vpop.f32.mrb[34].mxu1  ;;  %v1059_v31 = vrot.slane %v1052_v7, %v2438_v63  ;;  %v1967_v7 = vld [vmem:[%s2588_s5 + $0x10] sm:$0xff]  }
 0x43e   : > { %v1223_v32 = vadd.f32 %v1222_v24, %v2401_v13  ;;  %v1224_v34 = vpop.f32.mrb[35].mxu1  ;;  %v1227_v9 = vmax.f32 %v1219_v8, 0.0  ;;  %v1968_v8 = vld [vmem:[%s2588_s5 + $0x18] sm:$0xff]  }
 0x43f   : > { %v1225_v26 = vadd.f32 %v1224_v34, %v2401_v13  ;;  %1065 = vst.msk [vmem:[%s2452_s25] sm:$0x3] %vm2444_vm6, %v1059_v31  ;;  %v1228_v37 = vmax.f32 %v1221_v28, 0.0  ;;  %v1964_v13 = vld [vmem:[%s2586_s3 + $0x8] sm:$0xff]  }
 0x440   : > { %v1229_v36 = vmax.f32 %v1223_v32, 0.0 }
 0x441   : > { %v1230_v38 = vmax.f32 %v1225_v26, 0.0 }
 0x442   : > { %v1235_v39 = vpack.c.bf16 %v1229_v36, %v1227_v9 }
 0x443   : > { %v1236_v10 = vpack.c.bf16 %v1230_v38, %v1228_v37 }
 0x445   : > { %1277 = vmatprep.subr.bf16.mxu0 %v1236_v10  ;;  %1892 = vmatprep.subr.bf16.mxu1 %v1236_v10 }
 0x446   : > { %1278 = vmatpush1.bf16.msra.mxu0 %v1235_v39  ;;  %1893 = vmatpush1.bf16.msra.mxu1 %v1235_v39 }
 0x449   : > { %1836 = vmatmul.mubr.msk.bf16.vlgmr.msra.gmra.mrb[4].mxu0 %vm597_vm1, %v1963_v40  ;;  %1837 = vmatmul.mubr.msk.bf16.vlgmr.msra.gmra.mrb[36].mxu1 %vm597_vm1, %v1964_v13 }
 0x44a   : > { %1462 = vmatprep.mubr.bf16.mxu0 %v2051_v3 }
 0x51c   : > { %v1311_v41 = vpop.f32.mrb[4].mxu0  ;;  %v1321_v42 = vpop.f32.mrb[36].mxu1 }
 0x51d   : > { %v1312_v43 = vadd.f32 %v1311_v41, %v2397_v11  ;;  %v1322_v44 = vadd.f32 %v1321_v42, %v2399_v12  ;;  %v1313_v45 = vpop.f32.mrb[5].mxu0  ;;  %v1323_v46 = vpop.f32.mrb[37].mxu1 }
 0x51e   : > { %v1314_v47 = vadd.f32 %v1313_v45, %v2397_v11  ;;  %v1324_v48 = vadd.f32 %v1323_v46, %v2399_v12  ;;  %v1315_v49 = vpop.f32.mrb[6].mxu0  ;;  %v1325_v50 = vpop.f32.mrb[38].mxu1 }
 0x51f   : > { %v1316_v51 = vadd.f32 %v1315_v49, %v2405_v14  ;;  %v1326_v52 = vadd.f32 %v1325_v50, %v2409_v16  ;;  %v1317_v53 = vpop.f32.mrb[7].mxu0  ;;  %v1327_v54 = vpop.f32.mrb[39].mxu1  ;;  %v1330_v57 = vmax.f32 %v1312_v43, 0.0  ;;  %v1334_v58 = vmax.f32 %v1322_v44, 0.0 }
 0x520   : > { %v1318_v55 = vadd.f32 %v1317_v53, %v2405_v14  ;;  %v1328_v56 = vadd.f32 %v1327_v54, %v2409_v16  ;;  %v1331_v61 = vmax.f32 %v1314_v47, 0.0  ;;  %v1335_v11 = vmax.f32 %v1324_v48, 0.0  ;;  %v1965_v14 = vld [vmem:[%s2588_s5] sm:$0xff]   ;;  %v1966_v16 = vld [vmem:[%s2588_s5 + $0x8] sm:$0xff]  }
 0x521   : > { %v1332_v59 = vmax.f32 %v1316_v51, 0.0  ;;  %v1336_v60 = vmax.f32 %v1326_v52, 0.0 }
 0x522   : > { %v1333_v62 = vmax.f32 %v1318_v55, 0.0  ;;  %v1337_v12 = vmax.f32 %v1328_v56, 0.0 }
 0x523   : > { %v1346_v0 = vpack.c.bf16 %v1332_v59, %v1330_v57  ;;  %v1348_v1 = vpack.c.bf16 %v1336_v60, %v1334_v58 }
 0x524   : > { %v1347_v5 = vpack.c.bf16 %v1333_v62, %v1331_v61  ;;  %v1349_v6 = vpack.c.bf16 %v1337_v12, %v1335_v11 }
 0x526   : > { %1430 = vmatprep.subr.bf16.mxu0 %v1347_v5 }
 0x527   : > { %1431 = vmatpush1.bf16.msra.mxu0 %v1346_v0 }
 0x528   : > { %1432 = vmatprep.subr.bf16.mxu0 %v1349_v6 }
 0x52b   : > { %1433 = vmatpush1.bf16.msra.mxu0 %v1348_v1 }
 0x52e   : > { %1842 = vmatmul.mubr.msk.bf16.vlgmr.msra.gmra.mrb[8].mxu0 %vm745_vm2, %v1965_v14 }
 0x52f   : > { %1472 = vmatprep.mubr.bf16.mxu0 %v2051_v3 }
 0x536   : > { %1843 = vmatmul.mubr.msk.bf16.gmra.mrb[12].mxu0 %vm745_vm2, %v1966_v16 }
 0x537   : > { %1482 = vmatprep.mubr.bf16.mxu0 %v2051_v3 }
 0x53e   : > { %1844 = vmatmul.mubr.msk.bf16.gmra.mrb[16].mxu0 %vm745_vm2, %v1967_v7 }
 0x53f   : > { %1492 = vmatprep.mubr.bf16.mxu0 %v2051_v3 }
 0x546   : > { %1845 = vmatmul.mubr.msk.bf16.gmra.mrb[20].mxu0 %vm745_vm2, %v1968_v8 }
 0x547   : > { %1603 = vmatprep.mubr.bf16.mxu0 %v2051_v3 }
 0x601   : > { %v1464_v4 = vpop.f32.mrb[8].mxu0 }
 0x602   : > { %v1465_v28 = vadd.f32 %v1464_v4, %v2403_v2  ;;  %v1466_v24 = vpop.f32.mrb[9].mxu0 }
 0x603   : > { %v1467_v31 = vadd.f32 %v1466_v24, %v2403_v2  ;;  %v1468_v32 = vpop.f32.mrb[10].mxu0 }
 0x604   : > { %v1469_v34 = vadd.f32 %v1468_v32, %v2413_v18  ;;  %v1470_v26 = vpop.f32.mrb[11].mxu0  ;;  %v1503_v36 = vmax.f32 %v1465_v28, 0.0 }
 0x605   : > { %v1471_v9 = vadd.f32 %v1470_v26, %v2413_v18  ;;  %v1504_v38 = vmax.f32 %v1467_v31, 0.0  ;;  %v1969_v31 = vld [vmem:[%s2590_s7] sm:$0xff]  }
 0x606   : > { %v1505_v37 = vmax.f32 %v1469_v34, 0.0 }
 0x607   : > { %v1506_v39 = vmax.f32 %v1471_v9, 0.0 }
 0x608   : > { %v1523_v10 = vpack.c.bf16 %v1505_v37, %v1503_v36 }
 0x609   : > { %v1524_v40 = vpack.c.bf16 %v1506_v39, %v1504_v38  ;;  %v1474_v13 = vpop.f32.mrb[12].mxu0 }
 0x60a   : > { %v1475_v41 = vadd.f32 %v1474_v13, %v2407_v15  ;;  %v1476_v42 = vpop.f32.mrb[13].mxu0 }
 0x60b   : > { %v1477_v43 = vadd.f32 %v1476_v42, %v2407_v15  ;;  %v1478_v44 = vpop.f32.mrb[14].mxu0  ;;  %1571 = vmatprep.subr.bf16.mxu0 %v1524_v40 }
 0x60c   : > { %v1479_v2 = vadd.f32 %v1478_v44, %v2417_v20  ;;  %v1480_v45 = vpop.f32.mrb[15].mxu0  ;;  %1572 = vmatpush1.bf16.msra.mxu0 %v1523_v10  ;;  %v1507_v46 = vmax.f32 %v1475_v41, 0.0 }
 0x60d   : > { %v1481_v18 = vadd.f32 %v1480_v45, %v2417_v20  ;;  %v1508_v48 = vmax.f32 %v1477_v43, 0.0 }
 0x60e   : > { %v1509_v47 = vmax.f32 %v1479_v2, 0.0 }
 0x60f   : > { %v1510_v49 = vmax.f32 %v1481_v18, 0.0 }
 0x610   : > { %v1525_v50 = vpack.c.bf16 %v1509_v47, %v1507_v46 }
 0x611   : > { %v1526_v51 = vpack.c.bf16 %v1510_v49, %v1508_v48  ;;  %v1484_v52 = vpop.f32.mrb[16].mxu0 }
 0x612   : > { %v1485_v53 = vadd.f32 %v1484_v52, %v2411_v17  ;;  %v1486_v54 = vpop.f32.mrb[17].mxu0 }
 0x613   : > { %v1487_v15 = vadd.f32 %v1486_v54, %v2411_v17  ;;  %v1488_v55 = vpop.f32.mrb[18].mxu0  ;;  %1573 = vmatprep.subr.bf16.mxu0 %v1526_v51 }
 0x614   : > { %v1489_v56 = vadd.f32 %v1488_v55, %v2419_v21  ;;  %v1490_v57 = vpop.f32.mrb[19].mxu0  ;;  %1574 = vmatpush1.bf16.msra.mxu0 %v1525_v50  ;;  %v1511_v58 = vmax.f32 %v1485_v53, 0.0 }
 0x615   : > { %v1491_v20 = vadd.f32 %v1490_v57, %v2419_v21  ;;  %v1512_v60 = vmax.f32 %v1487_v15, 0.0 }
 0x616   : > { %v1513_v59 = vmax.f32 %v1489_v56, 0.0 }
 0x617   : > { %v1514_v61 = vmax.f32 %v1491_v20, 0.0 }
 0x618   : > { %v1527_v11 = vpack.c.bf16 %v1513_v59, %v1511_v58 }
 0x619   : > { %v1528_v62 = vpack.c.bf16 %v1514_v61, %v1512_v60  ;;  %v1494_v12 = vpop.f32.mrb[20].mxu0 }
 0x61a   : > { %v1495_v0 = vadd.f32 %v1494_v12, %v2415_v19  ;;  %v1496_v1 = vpop.f32.mrb[21].mxu0 }
 0x61b   : > { %v1497_v17 = vadd.f32 %v1496_v1, %v2415_v19  ;;  %v1498_v5 = vpop.f32.mrb[22].mxu0  ;;  %1575 = vmatprep.subr.bf16.mxu0 %v1528_v62  ;;  %v1970_v19 = vld [vmem:[%s2590_s7 + $0x8] sm:$0xff]  }
 0x61c   : > { %v1499_v6 = vadd.f32 %v1498_v5, %v2423_v23  ;;  %v1500_v14 = vpop.f32.mrb[23].mxu0  ;;  %1576 = vmatpush1.bf16.msra.mxu0 %v1527_v11  ;;  %v1515_v16 = vmax.f32 %v1495_v0, 0.0 }
 0x61d   : > { %v1501_v21 = vadd.f32 %v1500_v14, %v2423_v23  ;;  %v1516_v8 = vmax.f32 %v1497_v17, 0.0  ;;  %v1553_v23 = vpop.permute.xlu1 %1552 }
 0x61e   : > { %v1517_v7 = vmax.f32 %v1499_v6, 0.0 }
 0x61f   : > { %v1518_v4 = vmax.f32 %v1501_v21, 0.0 }
 0x620   : > { %v1529_v28 = vpack.c.bf16 %v1517_v7, %v1515_v16 }
 0x621   : > { %v1530_v24 = vpack.c.bf16 %v1518_v4, %v1516_v8  ;;  %v1644_v9 = vpop.permute.xlu1 %1643 }
 0x623   : > { %1577 = vmatprep.subr.bf16.mxu0 %v1530_v24 }
 0x624   : > { %1578 = vmatpush1.bf16.msra.mxu0 %v1529_v28 }
 0x625   : > { %v1649_v44 = vpop.permute.xlu1 %1648 }
 0x627   : > { %1848 = vmatmul.mubr.msk.bf16.vlgmr.msra.gmra.mrb[24].mxu0 %vm893_vm3, %v1969_v31 }
 0x628   : > { %1613 = vmatprep.mubr.bf16.mxu0 %v2051_v3 }
 0x629   : > { %v1654_v56 = vpop.permute.xlu1 %1653 }
 0x62d   : > { %v1686_v6 = vpop.permute.xlu1 %1685 }
 0x62e   : > { %v1691_v7 = vrot.slane %v1686_v6, %v1019_v35 }
 0x62f   : > { %1849 = vmatmul.mubr.msk.bf16.gmra.mrb[28].mxu0 %vm893_vm3, %v1970_v19 }
 0x6fa   : > { %v1605_v32 = vpop.f32.mrb[24].mxu0 }
 0x6fb   : > { %v1606_v34 = vadd.f32 %v1605_v32, %v2421_v22  ;;  %v1607_v26 = vpop.f32.mrb[25].mxu0 }
 0x6fc   : > { %v1608_v36 = vadd.f32 %v1607_v26, %v2421_v22  ;;  %v1609_v37 = vpop.f32.mrb[26].mxu0 }
 0x6fd   : > { %v1624_v38 = vmax.f32 %v1606_v34, 0.0  ;;  %v1610_v39 = vadd.f32 %v1609_v37, %v2425_v27  ;;  %v1611_v10 = vpop.f32.mrb[27].mxu0 }
 0x6fe   : > { %v1625_v3 = vmax.f32 %v1608_v36, 0.0  ;;  %v1612_v40 = vadd.f32 %v1611_v10, %v2425_v27 }
 0x6ff   : > { %v1626_v13 = vmax.f32 %v1610_v39, 0.0  ;;  %v1656_v42 = vmul.f32 %v2429_v33, %v1624_v38 }
 0x700   : > { %v1627_v41 = vmax.f32 %v1612_v40, 0.0  ;;  %v1657_v2 = vmul.f32 %v2429_v33, %v1625_v3 }
 0x701   : > { %v1658_v43 = vmul.f32 %v1644_v9, %v1626_v13 }
 0x702   : > { %v1659_v45 = vmul.f32 %v1644_v9, %v1627_v41  ;;  %v1615_v18 = vpop.f32.mrb[28].mxu0 }
 0x703   : > { %v1664_v46 = vadd.f32 %v1658_v43, %v1656_v42  ;;  %v1616_v22 = vadd.f32 %v1615_v18, %v2427_v29  ;;  %v1617_v47 = vpop.f32.mrb[29].mxu0 }
 0x704   : > { %v1673_v48 = vadd.f32 %v1659_v45, %v1657_v2  ;;  %v1618_v49 = vadd.f32 %v1617_v47, %v2427_v29  ;;  %v1619_v50 = vpop.f32.mrb[30].mxu0 }
 0x705   : > { %v1628_v51 = vmax.f32 %v1616_v22, 0.0  ;;  %v1620_v27 = vadd.f32 %v1619_v50, %v1553_v23  ;;  %v1621_v52 = vpop.f32.mrb[31].mxu0 }
 0x706   : > { %v1629_v53 = vmax.f32 %v1618_v49, 0.0  ;;  %v1622_v54 = vadd.f32 %v1621_v52, %v1553_v23 }
 0x707   : > { %v1660_v15 = vmul.f32 %v1649_v44, %v1628_v51  ;;  %v1630_v55 = vmax.f32 %v1620_v27, 0.0 }
 0x708   : > { %v1661_v57 = vmul.f32 %v1649_v44, %v1629_v53  ;;  %v1631_v33 = vmax.f32 %v1622_v54, 0.0 }
 0x709   : > { %v1665_v20 = vadd.f32 %v1664_v46, %v1660_v15  ;;  %v1662_v58 = vmul.f32 %v1654_v56, %v1630_v55 }
 0x70a   : > { %v1674_v59 = vadd.f32 %v1673_v48, %v1661_v57  ;;  %v1663_v60 = vmul.f32 %v1654_v56, %v1631_v33 }
 0x70b   : > { %v1666_v61 = vadd.f32 %v1665_v20, %v1662_v58 }
 0x70c   : > { %v1675_v11 = vadd.f32 %v1674_v59, %v1663_v60 }
 0x70d   : > { %v1667_v62 = vrot.slane %v1666_v61, 4 }
 0x70e   : > { %v1676_v12 = vrot.slane %v1675_v11, 4 }
 0x70f   : > { %v1668_v29 = vadd.f32 %v1667_v62, %v1666_v61 }
 0x710   : > { %v1677_v0 = vadd.f32 %v1676_v12, %v1675_v11 }
 0x711   : > { %v1669_v1 = vrot.slane %v1668_v29, 2 }
 0x712   : > { %v1678_v17 = vrot.slane %v1677_v0, 2 }
 0x713   : > { %v1670_v5 = vadd.f32 %v1669_v1, %v1668_v29 }
 0x714   : > { %v1679_v14 = vadd.f32 %v1678_v17, %v1677_v0 }
 0x715   : > { %v1671_v21 = vrot.slane %v1670_v5, 1 }
 0x716   : > { %v1680_v16 = vrot.slane %v1679_v14, 1 }
 0x717   : > { %v1672_v8 = vadd.f32 %v1671_v21, %v1670_v5 }
 0x718   : > { %v1681_v4 = vadd.f32 %v1680_v16, %v1679_v14 }
 0x719   : > { %v1692_v28 = vadd.f32 %v1691_v7, %v1672_v8 }
 0x71a   : > { %v1693_v24 = vadd.f32 %v1691_v7, %v1681_v4 }
 0x71b   : > { %v1694_v31 = vand.u32 2147483647, %v1692_v28  ;;  %vm1708_vm7 = vcmp.ge.f32.partialorder %v1692_v28, 0.0 }
 0x71c   : > { %v1695_v19 = vand.u32 2147483647, %v1693_v24  ;;  %vm1709_vm8 = vcmp.ge.f32.partialorder %v1693_v24, 0.0 }
 0x71d   : > { %v1696_v23 = vsub.f32 0.0, %v1694_v31 }
 0x71e   : > { %v1697_v32 = vsub.f32 0.0, %v1695_v19 }
 0x71f   : > { %v1698_v34 = vmul.f32 1.442695, %v1696_v23 }
 0x720   : > { %v1700_v26 = vmul.f32 1.442695, %v1697_v32 }
 0x721   : > { %1979 = vpow2.f32 %v1698_v34 }
 0x722   : > { %1981 = vpow2.f32 %v1700_v26 }
 0x72b   : > { %v1980_v9 = vpop.eup %1979 }
 0x72c   : > { %v1982_v36 = vpop.eup %1981  ;;  %v1702_v37 = vadd.f32 1.0, %v1980_v9 }
 0x72d   : > { %v1703_v38 = vadd.f32 1.0, %v1982_v36 }
 0x72e   : > { %1983 = vrcp.f32 %v1702_v37 }
 0x72f   : > { %1985 = vrcp.f32 %v1703_v38 }
 0x738   : > { %v1984_v30 = vpop.eup %1983 }
 0x739   : > { %v1986_v35 = vpop.eup %1985  ;;  %v1710_v39 = vmul.f32 %v1984_v30, %v1980_v9 }
 0x73a   : > { %v1711_v10 = vmul.f32 %v1986_v35, %v1982_v36 }
 0x73b   : > { %v1712_v3 = vsel %vm1708_vm7, %v1984_v30, %v1710_v39 }
 0x73c   : > { %v1713_v40 = vsel %vm1709_vm8, %v1986_v35, %v1711_v10 }
 0x73d   : > { %v1716_v13 = vcombine.low %v1712_v3, %v1713_v40 }
 0x73f   : > { %v1723_v41 = vrot.slane %v1716_v13, %v2438_v63 }
 0x741   : > { %v1730_v42 = vrot.slane %v1723_v41, %v2438_v63 }
 0x743   : > { %1732 = vst.msk [vmem:[%s2452_s25 + $0x2] sm:$0x3] %vm2444_vm6, %v1730_v42 }
 0x744   : > { %2000 = shalt.err (!%p1997_p3)
}
 0x745   : > { %s2001_s13 = scalar_lea.hbm %s2536_s12, 64  ;;  %s2005_s23 = scalar_lea.hbm %s2594_s11, 128 }
 0x746   : > { %p2002_p4 = scmp.ne.s32.totalorder %s2536_s12, %s2001_s13  ;;  %p2006_p9 = scmp.lt.u32.totalorder %s2536_s12, %s2594_s11 }
 0x747   : > { %p2007_p10 = scmp.lt.u32.totalorder %s2005_s23, %s2001_s13  ;;  %p2009_p12 = scmp.lt.u32.totalorder %s2001_s13, %s2536_s12 }
 0x748   : > { %p2003_p7 = pnand %p2002_p4, %p2152_p5 }
 0x749   : > { %p2008_p11 = por %p2007_p10, %p2006_p9 }
 0x74a   : > { %p2004_p8 = pneg %p2003_p7 }
 0x74b   : > { %p2010_p13 = por %p2009_p12, %p2008_p11 }
 0x74d   : > { %p2011_p0 = pnand %p2010_p13, %p2004_p8 }
 0x74f   : > { %2014 = shalt.err (!%p2011_p0)
}
 0x750   : > { %1910 = dma.vmem_to_hbm [thread:$0]  (%p2152_p5), %s2538_s10, 64, %s2536_s12, %s1734_s14  }
 0x751 PF: > { %p1916_p1 = scmp.ge.s32.totalorder %s2049_s22, 2  ;;  %s1760_s15 = sand.u32 1, %s2037_s19  }
 0x752   : > { %s1761_s17 = scalar_lea.sflag [#allocation4], %s1760_s15 }
 0x753   : > { %p1913_p2 = pnand %p1916_p1, %p2156_p6 }
 0x755   : > { %2032 = dma.done.wait (!%p1913_p2), %s1761_s17, 64  }
 0x756   : > { %2034 = vsyncadd (!%p1913_p2), %s1761_s17, 4294967232  ;;  %p23_p3 = scmp.ge.s32.totalorder %s2140_s24, 4   ;;  %s2599_s19 = smov %s2041_s20 }
 0x757   : > { %s2600_s20 = smov %s2045_s21  ;;  %s2601_s21 = smov %s2150_s27 }
 0x758   : > { %s2602_s22 = smov %s2140_s24  ;;  %25 = sbr.rel (!%p23_p3) target bundleno = 6 (0x6), region = 99 }
 0x75f   :  { %1766 = vsyncpa [#allocation4], 1 }
 0x760   :  { %1768 = vsyncpa [#allocation4 + $0x1], 1 }

</bundles_post_ra>
